<compile_context>
chip_gen: v6e
topology: v6e:2x2x1
jax: 0.10.0
libtpu: 0.0.40
codegen_flags: <defaults>
</compile_context>

<pallas_src>
import math

import jax
import jax.numpy as jnp
from jax.experimental import pallas as pl
from jax.experimental.pallas import tpu as pltpu

# ---------------- synthetic config ----------------
HIDDEN = 32
NUM_HEADS = 2
HEAD_DIM = HIDDEN // NUM_HEADS
NUM_LAYERS = 2
INTERMEDIATE = 64
VOCAB = 64
MAX_POS = 16
NUM_LABELS = 3
CLF_PAD = 128          # lane-dense classifier output; sliced back to NUM_LABELS
SEQ = 8
BATCH = 2
LN_EPS = 1e-12
INIT_RANGE = 0.02


# ---------------- in-kernel helpers ----------------
def _gelu(x):
    # TODO(synk): BERT uses exact erf-GELU; tanh approximation used here (EUP-friendly).
    return 0.5 * x * (1.0 + jnp.tanh(0.7978845608028654 * (x + 0.044715 * x * x * x)))


def _ln(x, g, b):
    mu = jnp.mean(x, axis=-1, keepdims=True)
    var = jnp.mean((x - mu) * (x - mu), axis=-1, keepdims=True)
    return (x - mu) * jax.lax.rsqrt(var + LN_EPS) * g + b


# ---------------- fused Udalm kernel (one grid step == one batch item) ----------------
def _udalm_kernel(
    emb_ref, mask_ref,
    emb_ln_g_ref, emb_ln_b_ref,
    qkv_w_ref, qkv_b_ref, ao_w_ref, ao_b_ref,
    attn_ln_g_ref, attn_ln_b_ref,
    i_w_ref, i_b_ref, o_w_ref, o_b_ref,
    out_ln_g_ref, out_ln_b_ref,
    pooler_w_ref, pooler_b_ref, clf_w_ref, clf_b_ref,
    mlm_t_w_ref, mlm_t_b_ref, mlm_ln_g_ref, mlm_ln_b_ref,
    mlm_dec_w_ref, mlm_dec_b_ref,
    clf_out_ref, mlm_out_ref,
):
    x = emb_ref[0]                                    # (S, H)
    bias = (1.0 - mask_ref[0]) * (-1e9)               # (1, S) additive attention bias

    # embedding LayerNorm (no residual)
    x = _ln(x, emb_ln_g_ref[...], emb_ln_b_ref[...])

    inv_sqrt_d = 1.0 / math.sqrt(HEAD_DIM)
    for l in range(NUM_LAYERS):                       # static unroll (2 layers)
        # fused QKV projection: (S, H) @ (H, 3H)
        qkv = jnp.dot(x, qkv_w_ref[l], preferred_element_type=jnp.float32) + qkv_b_ref[l]

        heads = []
        for h in range(NUM_HEADS):                    # static unroll (2 heads)
            lo = h * HEAD_DIM
            q = qkv[:, lo:lo + HEAD_DIM]
            k = qkv[:, HIDDEN + lo:HIDDEN + lo + HEAD_DIM]
            v = qkv[:, 2 * HIDDEN + lo:2 * HIDDEN + lo + HEAD_DIM]
            s = jax.lax.dot_general(q, k, (((1,), (1,)), ((), ())),
                                    preferred_element_type=jnp.float32)   # (S, S)
            s = s * inv_sqrt_d + bias
            s = s - jnp.max(s, axis=-1, keepdims=True)
            p = jnp.exp(s)
            p = p * pl.reciprocal(jnp.sum(p, axis=-1, keepdims=True), approx=True)
            heads.append(jnp.dot(p, v, preferred_element_type=jnp.float32))
        ctx = jnp.concatenate(heads, axis=-1)         # (S, H)

        attn_out = jnp.dot(ctx, ao_w_ref[l], preferred_element_type=jnp.float32) + ao_b_ref[l]
        x = _ln(attn_out + x, attn_ln_g_ref[l], attn_ln_b_ref[l])

        inter = _gelu(jnp.dot(x, i_w_ref[l], preferred_element_type=jnp.float32) + i_b_ref[l])
        ffn = jnp.dot(inter, o_w_ref[l], preferred_element_type=jnp.float32) + o_b_ref[l]
        x = _ln(ffn + x, out_ln_g_ref[l], out_ln_b_ref[l])

    # pooler (CLS token) + classifier; output is lane-dense (padded to CLF_PAD)
    pooled = jnp.tanh(
        jnp.dot(x[0:1, :], pooler_w_ref[...], preferred_element_type=jnp.float32)
        + pooler_b_ref[...])
    clf_out_ref[0] = (jnp.dot(pooled, clf_w_ref[...], preferred_element_type=jnp.float32)
                      + clf_b_ref[...])

    # MLM head: dense + gelu + LayerNorm + decoder, fully fused
    hm = _gelu(jnp.dot(x, mlm_t_w_ref[...], preferred_element_type=jnp.float32)
               + mlm_t_b_ref[...])
    hm = _ln(hm, mlm_ln_g_ref[...], mlm_ln_b_ref[...])
    mlm_out_ref[0] = (jnp.dot(hm, mlm_dec_w_ref[...], preferred_element_type=jnp.float32)
                      + mlm_dec_b_ref[...])


# ---------------- pallas_call wrapper ----------------
def _fused_forward(emb, mask3, bert, clf_w, clf_b, mlm_t_w, mlm_t_b,
                   mlm_ln_g, mlm_ln_b, mlm_dec_w, mlm_dec_b):
    B2, S, H = emb.shape

    weights = (
        bert["emb_ln_g"], bert["emb_ln_b"],
        bert["qkv_w"], bert["qkv_b"], bert["ao_w"], bert["ao_b"],
        bert["attn_ln_g"], bert["attn_ln_b"],
        bert["i_w"], bert["i_b"], bert["o_w"], bert["o_b"],
        bert["out_ln_g"], bert["out_ln_b"],
        bert["pooler_w"], bert["pooler_b"], clf_w, clf_b,
        mlm_t_w, mlm_t_b, mlm_ln_g, mlm_ln_b, mlm_dec_w, mlm_dec_b,
    )

    def resident(arr):
        # full-array block, constant index_map -> DMA'd once, stays in VMEM
        nd = arr.ndim
        return pl.BlockSpec(arr.shape, lambda b, _n=nd: (0,) * _n)

    in_specs = [
        pl.BlockSpec((1, S, H), lambda b: (b, 0, 0)),   # embeddings, per batch item
        pl.BlockSpec((1, 1, S), lambda b: (b, 0, 0)),   # attention mask, per batch item
    ] + [resident(w) for w in weights]

    out_shape = (
        jax.ShapeDtypeStruct((B2, 1, CLF_PAD), jnp.float32),
        jax.ShapeDtypeStruct((B2, S, VOCAB), jnp.float32),
    )
    out_specs = (
        pl.BlockSpec((1, 1, CLF_PAD), lambda b: (b, 0, 0)),
        pl.BlockSpec((1, S, VOCAB), lambda b: (b, 0, 0)),
    )

    return pl.pallas_call(
        _udalm_kernel,
        out_shape=out_shape,
        grid=(B2,),
        in_specs=in_specs,
        out_specs=out_specs,
        compiler_params=pltpu.CompilerParams(dimension_semantics=("parallel",)),
    )(emb, mask3, *weights)


def udalm_forward(params, tok_ids, tok_mask, mlm_ids, mlm_mask):
    # matches PyTorch: .squeeze(1) on (B, 1, S) inputs
    tok_ids = tok_ids[:, 0, :]
    tok_mask = tok_mask[:, 0, :]
    mlm_ids = mlm_ids[:, 0, :]
    mlm_mask = mlm_mask[:, 0, :]
    B, S = tok_ids.shape

    # stack the two BERT streams into one batched forward (identical weights)
    ids = jnp.concatenate([tok_ids, mlm_ids], axis=0)                   # (2B, S)
    mask = jnp.concatenate([tok_mask, mlm_mask], axis=0).astype(jnp.float32)

    bert = params["bert"]
    # embedding lookup + position + token-type(0); gather stays in XLA
    emb = (jnp.take(bert["word_emb"], ids, axis=0)
           + bert["pos_emb"][None, :S, :]
           + bert["type_emb"][0][None, None, :])                        # (2B, S, H)

    clf_pad, mlm_all = _fused_forward(
        emb, mask.reshape(2 * B, 1, S), bert,
        params["clf_w"], params["clf_b"],
        params["mlm_t_w"], params["mlm_t_b"],
        params["mlm_ln_g"], params["mlm_ln_b"],
        params["mlm_dec_w"], params["mlm_dec_b"])

    token_clf_out = clf_pad[:B, 0, :NUM_LABELS]   # classifier from the token stream only
    mlm_out = mlm_all[B:]                         # MLM head from the mlm stream only
    return token_clf_out, mlm_out


# ---------------- deterministic parameter init (packed layout) ----------------
def init_params(key):
    keys = iter(jax.random.split(key, 64))

    def normal(shape):
        return (INIT_RANGE * jax.random.normal(next(keys), shape)).astype(jnp.float32)

    def ones_row(n):
        return jnp.ones((1, n), jnp.float32)

    def zeros_row(n):
        return jnp.zeros((1, n), jnp.float32)

    qkv_w, ao_w, i_w, o_w = [], [], [], []
    for _ in range(NUM_LAYERS):
        q = normal((HIDDEN, HIDDEN))
        k = normal((HIDDEN, HIDDEN))
        v = normal((HIDDEN, HIDDEN))
        qkv_w.append(jnp.concatenate([q, k, v], axis=-1))   # (H, 3H) fused QKV
        ao_w.append(normal((HIDDEN, HIDDEN)))
        i_w.append(normal((HIDDEN, INTERMEDIATE)))
        o_w.append(normal((INTERMEDIATE, HIDDEN)))

    L = NUM_LAYERS
    bert = dict(
        word_emb=normal((VOCAB, HIDDEN)),
        pos_emb=normal((MAX_POS, HIDDEN)),
        type_emb=normal((2, HIDDEN)),
        emb_ln_g=ones_row(HIDDEN), emb_ln_b=zeros_row(HIDDEN),
        qkv_w=jnp.stack(qkv_w), qkv_b=jnp.zeros((L, 1, 3 * HIDDEN), jnp.float32),
        ao_w=jnp.stack(ao_w), ao_b=jnp.zeros((L, 1, HIDDEN), jnp.float32),
        attn_ln_g=jnp.ones((L, 1, HIDDEN), jnp.float32),
        attn_ln_b=jnp.zeros((L, 1, HIDDEN), jnp.float32),
        i_w=jnp.stack(i_w), i_b=jnp.zeros((L, 1, INTERMEDIATE), jnp.float32),
        o_w=jnp.stack(o_w), o_b=jnp.zeros((L, 1, HIDDEN), jnp.float32),
        out_ln_g=jnp.ones((L, 1, HIDDEN), jnp.float32),
        out_ln_b=jnp.zeros((L, 1, HIDDEN), jnp.float32),
        pooler_w=normal((HIDDEN, HIDDEN)), pooler_b=zeros_row(HIDDEN),
    )

    # classifier weights padded once to a lane-dense 128-wide output
    clf_w = jnp.zeros((HIDDEN, CLF_PAD), jnp.float32).at[:, :NUM_LABELS].set(
        normal((HIDDEN, NUM_LABELS)))

    return dict(
        bert=bert,
        clf_w=clf_w, clf_b=jnp.zeros((1, CLF_PAD), jnp.float32),
        mlm_t_w=normal((HIDDEN, HIDDEN)), mlm_t_b=zeros_row(HIDDEN),
        mlm_ln_g=ones_row(HIDDEN), mlm_ln_b=zeros_row(HIDDEN),
        # TODO(synk): standard BERT ties the MLM decoder to word_emb.T; kept independent here.
        mlm_dec_w=normal((HIDDEN, VOCAB)), mlm_dec_b=zeros_row(VOCAB),
    )


if __name__ == "__main__":
    key = jax.random.PRNGKey(0)
    kp, k1, k2 = jax.random.split(key, 3)
    params = init_params(kp)

    tok_ids = jax.random.randint(k1, (BATCH, 1, SEQ), 0, VOCAB, dtype=jnp.int32)
    mlm_ids = jax.random.randint(k2, (BATCH, 1, SEQ), 0, VOCAB, dtype=jnp.int32)
    tok_mask = jnp.ones((BATCH, 1, SEQ), jnp.int32)
    mlm_mask = jnp.ones((BATCH, 1, SEQ), jnp.int32).at[1, 0, SEQ - 2:].set(0)

    fwd = jax.jit(udalm_forward)
    token_clf_out, mlm_out = fwd(params, tok_ids, tok_mask, mlm_ids, mlm_mask)
    jax.block_until_ready((token_clf_out, mlm_out))

    assert token_clf_out.shape == (BATCH, NUM_LABELS)
    assert mlm_out.shape == (BATCH, SEQ, VOCAB)
    assert bool(jnp.all(jnp.isfinite(token_clf_out))) and bool(jnp.all(jnp.isfinite(mlm_out)))
    print("KERNEL_OK")
</pallas_src>

<mosaic_0001>
module attributes {stable_mosaic.version = 11 : i64} {
  func.func @_udalm_kernel(%arg0: i32, %arg1: memref<1x8x32xf32, #tpu.memory_space<vmem>>, %arg2: memref<1x1x8xf32, #tpu.memory_space<vmem>>, %arg3: memref<1x32xf32, #tpu.memory_space<vmem>>, %arg4: memref<1x32xf32, #tpu.memory_space<vmem>>, %arg5: memref<2x32x96xf32, #tpu.memory_space<vmem>>, %arg6: memref<2x1x96xf32, #tpu.memory_space<vmem>>, %arg7: memref<2x32x32xf32, #tpu.memory_space<vmem>>, %arg8: memref<2x1x32xf32, #tpu.memory_space<vmem>>, %arg9: memref<2x1x32xf32, #tpu.memory_space<vmem>>, %arg10: memref<2x1x32xf32, #tpu.memory_space<vmem>>, %arg11: memref<2x32x64xf32, #tpu.memory_space<vmem>>, %arg12: memref<2x1x64xf32, #tpu.memory_space<vmem>>, %arg13: memref<2x64x32xf32, #tpu.memory_space<vmem>>, %arg14: memref<2x1x32xf32, #tpu.memory_space<vmem>>, %arg15: memref<2x1x32xf32, #tpu.memory_space<vmem>>, %arg16: memref<2x1x32xf32, #tpu.memory_space<vmem>>, %arg17: memref<32x32xf32, #tpu.memory_space<vmem>>, %arg18: memref<1x32xf32, #tpu.memory_space<vmem>>, %arg19: memref<32x128xf32, #tpu.memory_space<vmem>>, %arg20: memref<1x128xf32, #tpu.memory_space<vmem>>, %arg21: memref<32x32xf32, #tpu.memory_space<vmem>>, %arg22: memref<1x32xf32, #tpu.memory_space<vmem>>, %arg23: memref<1x32xf32, #tpu.memory_space<vmem>>, %arg24: memref<1x32xf32, #tpu.memory_space<vmem>>, %arg25: memref<32x64xf32, #tpu.memory_space<vmem>>, %arg26: memref<1x64xf32, #tpu.memory_space<vmem>>, %arg27: memref<1x1x128xf32, #tpu.memory_space<vmem>>, %arg28: memref<1x8x64xf32, #tpu.memory_space<vmem>>) attributes {dimension_semantics = [#tpu.dimension_semantics<parallel>], iteration_bounds = array<i64: 4>, scalar_prefetch = 0 : i64, scratch_operands = 0 : i64, tpu.core_type = #tpu.core_type<tc>, window_params = [{transform_indices = @transform_0, window_bounds = array<i64: 1, 8, 32>}, {transform_indices = @transform_1, window_bounds = array<i64: 1, 1, 8>}, {pipeline_mode = #tpu.pipeline_mode<synchronous>, transform_indices = @transform_2, window_bounds = array<i64: 1, 32>}, {pipeline_mode = #tpu.pipeline_mode<synchronous>, transform_indices = @transform_3, window_bounds = array<i64: 1, 32>}, {pipeline_mode = #tpu.pipeline_mode<synchronous>, transform_indices = @transform_4, window_bounds = array<i64: 2, 32, 96>}, {pipeline_mode = #tpu.pipeline_mode<synchronous>, transform_indices = @transform_5, window_bounds = array<i64: 2, 1, 96>}, {pipeline_mode = #tpu.pipeline_mode<synchronous>, transform_indices = @transform_6, window_bounds = array<i64: 2, 32, 32>}, {pipeline_mode = #tpu.pipeline_mode<synchronous>, transform_indices = @transform_7, window_bounds = array<i64: 2, 1, 32>}, {pipeline_mode = #tpu.pipeline_mode<synchronous>, transform_indices = @transform_8, window_bounds = array<i64: 2, 1, 32>}, {pipeline_mode = #tpu.pipeline_mode<synchronous>, transform_indices = @transform_9, window_bounds = array<i64: 2, 1, 32>}, {pipeline_mode = #tpu.pipeline_mode<synchronous>, transform_indices = @transform_10, window_bounds = array<i64: 2, 32, 64>}, {pipeline_mode = #tpu.pipeline_mode<synchronous>, transform_indices = @transform_11, window_bounds = array<i64: 2, 1, 64>}, {pipeline_mode = #tpu.pipeline_mode<synchronous>, transform_indices = @transform_12, window_bounds = array<i64: 2, 64, 32>}, {pipeline_mode = #tpu.pipeline_mode<synchronous>, transform_indices = @transform_13, window_bounds = array<i64: 2, 1, 32>}, {pipeline_mode = #tpu.pipeline_mode<synchronous>, transform_indices = @transform_14, window_bounds = array<i64: 2, 1, 32>}, {pipeline_mode = #tpu.pipeline_mode<synchronous>, transform_indices = @transform_15, window_bounds = array<i64: 2, 1, 32>}, {pipeline_mode = #tpu.pipeline_mode<synchronous>, transform_indices = @transform_16, window_bounds = array<i64: 32, 32>}, {pipeline_mode = #tpu.pipeline_mode<synchronous>, transform_indices = @transform_17, window_bounds = array<i64: 1, 32>}, {pipeline_mode = #tpu.pipeline_mode<synchronous>, transform_indices = @transform_18, window_bounds = array<i64: 32, 128>}, {pipeline_mode = #tpu.pipeline_mode<synchronous>, transform_indices = @transform_19, window_bounds = array<i64: 1, 128>}, {pipeline_mode = #tpu.pipeline_mode<synchronous>, transform_indices = @transform_20, window_bounds = array<i64: 32, 32>}, {pipeline_mode = #tpu.pipeline_mode<synchronous>, transform_indices = @transform_21, window_bounds = array<i64: 1, 32>}, {pipeline_mode = #tpu.pipeline_mode<synchronous>, transform_indices = @transform_22, window_bounds = array<i64: 1, 32>}, {pipeline_mode = #tpu.pipeline_mode<synchronous>, transform_indices = @transform_23, window_bounds = array<i64: 1, 32>}, {pipeline_mode = #tpu.pipeline_mode<synchronous>, transform_indices = @transform_24, window_bounds = array<i64: 32, 64>}, {pipeline_mode = #tpu.pipeline_mode<synchronous>, transform_indices = @transform_25, window_bounds = array<i64: 1, 64>}, {transform_indices = @transform_26, window_bounds = array<i64: 1, 1, 128>}, {transform_indices = @transform_27, window_bounds = array<i64: 1, 8, 64>}]} {
    %c0 = arith.constant 0 : index
    %c0_0 = arith.constant 0 : index
    %c0_1 = arith.constant 0 : index
    %0 = vector.load %arg1[%c0, %c0_0, %c0_1] : memref<1x8x32xf32, #tpu.memory_space<vmem>>, vector<1x8x32xf32>
    %1 = vector.shape_cast %0 : vector<1x8x32xf32> to vector<8x32xf32>
    %c0_2 = arith.constant 0 : index
    %c0_3 = arith.constant 0 : index
    %c0_4 = arith.constant 0 : index
    %2 = vector.load %arg2[%c0_2, %c0_3, %c0_4] : memref<1x1x8xf32, #tpu.memory_space<vmem>>, vector<1x1x8xf32>
    %3 = vector.shape_cast %2 : vector<1x1x8xf32> to vector<1x8xf32>
    %cst = arith.constant 1.000000e+00 : f32
    %4 = vector.broadcast %cst : f32 to vector<1x8xf32>
    %5 = arith.subf %4, %3 : vector<1x8xf32>
    %cst_5 = arith.constant -1.000000e+09 : f32
    %6 = vector.broadcast %cst_5 : f32 to vector<1x8xf32>
    %7 = arith.mulf %5, %6 : vector<1x8xf32>
    %c0_6 = arith.constant 0 : index
    %c0_7 = arith.constant 0 : index
    %8 = vector.load %arg3[%c0_6, %c0_7] : memref<1x32xf32, #tpu.memory_space<vmem>>, vector<1x32xf32>
    %c0_8 = arith.constant 0 : index
    %c0_9 = arith.constant 0 : index
    %9 = vector.load %arg4[%c0_8, %c0_9] : memref<1x32xf32, #tpu.memory_space<vmem>>, vector<1x32xf32>
    %cst_10 = arith.constant dense<0.000000e+00> : vector<8xf32>
    %10 = vector.multi_reduction <add>, %1, %cst_10 [1] : vector<8x32xf32> to vector<8xf32>
    %11 = vector.shape_cast %10 : vector<8xf32> to vector<8x1xf32>
    %cst_11 = arith.constant 3.200000e+01 : f32
    %12 = vector.broadcast %cst_11 : f32 to vector<8x1xf32>
    %13 = arith.divf %11, %12 : vector<8x1xf32>
    %14 = vector.broadcast %13 : vector<8x1xf32> to vector<8x32xf32>
    %15 = arith.subf %1, %14 : vector<8x32xf32>
    %16 = vector.broadcast %13 : vector<8x1xf32> to vector<8x32xf32>
    %17 = arith.subf %1, %16 : vector<8x32xf32>
    %18 = arith.mulf %15, %17 : vector<8x32xf32>
    %cst_12 = arith.constant dense<0.000000e+00> : vector<8xf32>
    %19 = vector.multi_reduction <add>, %18, %cst_12 [1] : vector<8x32xf32> to vector<8xf32>
    %20 = vector.shape_cast %19 : vector<8xf32> to vector<8x1xf32>
    %cst_13 = arith.constant 3.200000e+01 : f32
    %21 = vector.broadcast %cst_13 : f32 to vector<8x1xf32>
    %22 = arith.divf %20, %21 : vector<8x1xf32>
    %23 = vector.broadcast %13 : vector<8x1xf32> to vector<8x32xf32>
    %24 = arith.subf %1, %23 : vector<8x32xf32>
    %cst_14 = arith.constant 9.99999996E-13 : f32
    %25 = vector.broadcast %cst_14 : f32 to vector<8x1xf32>
    %26 = arith.addf %22, %25 : vector<8x1xf32>
    %27 = math.rsqrt %26 : vector<8x1xf32>
    %28 = vector.broadcast %27 : vector<8x1xf32> to vector<8x32xf32>
    %29 = arith.mulf %24, %28 : vector<8x32xf32>
    %30 = vector.broadcast %8 : vector<1x32xf32> to vector<8x32xf32>
    %31 = arith.mulf %29, %30 : vector<8x32xf32>
    %32 = vector.broadcast %9 : vector<1x32xf32> to vector<8x32xf32>
    %33 = arith.addf %31, %32 : vector<8x32xf32>
    %c0_15 = arith.constant 0 : index
    %c0_16 = arith.constant 0 : index
    %c0_17 = arith.constant 0 : index
    %34 = vector.load %arg5[%c0_15, %c0_16, %c0_17] : memref<2x32x96xf32, #tpu.memory_space<vmem>>, vector<1x32x96xf32>
    %35 = vector.shape_cast %34 : vector<1x32x96xf32> to vector<32x96xf32>
    %cst_18 = arith.constant dense<0.000000e+00> : vector<8x96xf32>
    %36 = tpu.matmul %33, %35, %cst_18 {dimension_numbers = #tpu.dot_dimension_numbers<[1], [0], [0], [1], [0, 0, 1, 1], [], []>} : vector<8x32xf32>, vector<32x96xf32>, vector<8x96xf32> -> vector<8x96xf32>
    %c0_19 = arith.constant 0 : index
    %c0_20 = arith.constant 0 : index
    %c0_21 = arith.constant 0 : index
    %37 = vector.load %arg6[%c0_19, %c0_20, %c0_21] : memref<2x1x96xf32, #tpu.memory_space<vmem>>, vector<1x1x96xf32>
    %38 = vector.shape_cast %37 : vector<1x1x96xf32> to vector<1x96xf32>
    %39 = vector.broadcast %38 : vector<1x96xf32> to vector<8x96xf32>
    %40 = arith.addf %36, %39 : vector<8x96xf32>
    %41 = vector.extract_strided_slice %40 {offsets = [0, 0], sizes = [8, 16], strides = [1, 1]} : vector<8x96xf32> to vector<8x16xf32>
    %42 = vector.extract_strided_slice %40 {offsets = [0, 32], sizes = [8, 16], strides = [1, 1]} : vector<8x96xf32> to vector<8x16xf32>
    %43 = vector.extract_strided_slice %40 {offsets = [0, 64], sizes = [8, 16], strides = [1, 1]} : vector<8x96xf32> to vector<8x16xf32>
    %cst_22 = arith.constant dense<0.000000e+00> : vector<8x8xf32>
    %44 = tpu.matmul %41, %42, %cst_22 {dimension_numbers = #tpu.dot_dimension_numbers<[1], [1], [0], [0], [0, 0, 1, 0], [], []>} : vector<8x16xf32>, vector<8x16xf32>, vector<8x8xf32> -> vector<8x8xf32>
    %cst_23 = arith.constant 2.500000e-01 : f32
    %45 = vector.broadcast %cst_23 : f32 to vector<8x8xf32>
    %46 = arith.mulf %44, %45 : vector<8x8xf32>
    %47 = vector.broadcast %7 : vector<1x8xf32> to vector<8x8xf32>
    %48 = arith.addf %46, %47 : vector<8x8xf32>
    %cst_24 = arith.constant dense<0xFF800000> : vector<8xf32>
    %49 = vector.multi_reduction <maximumf>, %48, %cst_24 [1] : vector<8x8xf32> to vector<8xf32>
    %50 = vector.shape_cast %49 : vector<8xf32> to vector<8x1xf32>
    %51 = vector.broadcast %50 : vector<8x1xf32> to vector<8x8xf32>
    %52 = arith.subf %48, %51 : vector<8x8xf32>
    %53 = math.exp %52 : vector<8x8xf32>
    %cst_25 = arith.constant dense<0.000000e+00> : vector<8xf32>
    %54 = vector.multi_reduction <add>, %53, %cst_25 [1] : vector<8x8xf32> to vector<8xf32>
    %55 = vector.shape_cast %54 : vector<8xf32> to vector<8x1xf32>
    %56 = tpu.reciprocal %55 {approx = true} : vector<8x1xf32> -> vector<8x1xf32>
    %57 = vector.broadcast %56 : vector<8x1xf32> to vector<8x8xf32>
    %58 = arith.mulf %53, %57 : vector<8x8xf32>
    %cst_26 = arith.constant dense<0.000000e+00> : vector<8x16xf32>
    %59 = tpu.matmul %58, %43, %cst_26 {dimension_numbers = #tpu.dot_dimension_numbers<[1], [0], [0], [1], [0, 0, 1, 1], [], []>} : vector<8x8xf32>, vector<8x16xf32>, vector<8x16xf32> -> vector<8x16xf32>
    %60 = vector.extract_strided_slice %40 {offsets = [0, 16], sizes = [8, 16], strides = [1, 1]} : vector<8x96xf32> to vector<8x16xf32>
    %61 = vector.extract_strided_slice %40 {offsets = [0, 48], sizes = [8, 16], strides = [1, 1]} : vector<8x96xf32> to vector<8x16xf32>
    %62 = vector.extract_strided_slice %40 {offsets = [0, 80], sizes = [8, 16], strides = [1, 1]} : vector<8x96xf32> to vector<8x16xf32>
    %cst_27 = arith.constant dense<0.000000e+00> : vector<8x8xf32>
    %63 = tpu.matmul %60, %61, %cst_27 {dimension_numbers = #tpu.dot_dimension_numbers<[1], [1], [0], [0], [0, 0, 1, 0], [], []>} : vector<8x16xf32>, vector<8x16xf32>, vector<8x8xf32> -> vector<8x8xf32>
    %cst_28 = arith.constant 2.500000e-01 : f32
    %64 = vector.broadcast %cst_28 : f32 to vector<8x8xf32>
    %65 = arith.mulf %63, %64 : vector<8x8xf32>
    %66 = vector.broadcast %7 : vector<1x8xf32> to vector<8x8xf32>
    %67 = arith.addf %65, %66 : vector<8x8xf32>
    %cst_29 = arith.constant dense<0xFF800000> : vector<8xf32>
    %68 = vector.multi_reduction <maximumf>, %67, %cst_29 [1] : vector<8x8xf32> to vector<8xf32>
    %69 = vector.shape_cast %68 : vector<8xf32> to vector<8x1xf32>
    %70 = vector.broadcast %69 : vector<8x1xf32> to vector<8x8xf32>
    %71 = arith.subf %67, %70 : vector<8x8xf32>
    %72 = math.exp %71 : vector<8x8xf32>
    %cst_30 = arith.constant dense<0.000000e+00> : vector<8xf32>
    %73 = vector.multi_reduction <add>, %72, %cst_30 [1] : vector<8x8xf32> to vector<8xf32>
    %74 = vector.shape_cast %73 : vector<8xf32> to vector<8x1xf32>
    %75 = tpu.reciprocal %74 {approx = true} : vector<8x1xf32> -> vector<8x1xf32>
    %76 = vector.broadcast %75 : vector<8x1xf32> to vector<8x8xf32>
    %77 = arith.mulf %72, %76 : vector<8x8xf32>
    %cst_31 = arith.constant dense<0.000000e+00> : vector<8x16xf32>
    %78 = tpu.matmul %77, %62, %cst_31 {dimension_numbers = #tpu.dot_dimension_numbers<[1], [0], [0], [1], [0, 0, 1, 1], [], []>} : vector<8x8xf32>, vector<8x16xf32>, vector<8x16xf32> -> vector<8x16xf32>
    %79 = tpu.concatenate %59, %78 in 1 : vector<8x16xf32>, vector<8x16xf32> -> vector<8x32xf32>
    %c0_32 = arith.constant 0 : index
    %c0_33 = arith.constant 0 : index
    %c0_34 = arith.constant 0 : index
    %80 = vector.load %arg7[%c0_32, %c0_33, %c0_34] : memref<2x32x32xf32, #tpu.memory_space<vmem>>, vector<1x32x32xf32>
    %81 = vector.shape_cast %80 : vector<1x32x32xf32> to vector<32x32xf32>
    %cst_35 = arith.constant dense<0.000000e+00> : vector<8x32xf32>
    %82 = tpu.matmul %79, %81, %cst_35 {dimension_numbers = #tpu.dot_dimension_numbers<[1], [0], [0], [1], [0, 0, 1, 1], [], []>} : vector<8x32xf32>, vector<32x32xf32>, vector<8x32xf32> -> vector<8x32xf32>
    %c0_36 = arith.constant 0 : index
    %c0_37 = arith.constant 0 : index
    %c0_38 = arith.constant 0 : index
    %83 = vector.load %arg8[%c0_36, %c0_37, %c0_38] : memref<2x1x32xf32, #tpu.memory_space<vmem>>, vector<1x1x32xf32>
    %84 = vector.shape_cast %83 : vector<1x1x32xf32> to vector<1x32xf32>
    %85 = vector.broadcast %84 : vector<1x32xf32> to vector<8x32xf32>
    %86 = arith.addf %82, %85 : vector<8x32xf32>
    %87 = arith.addf %86, %33 : vector<8x32xf32>
    %c0_39 = arith.constant 0 : index
    %c0_40 = arith.constant 0 : index
    %c0_41 = arith.constant 0 : index
    %88 = vector.load %arg9[%c0_39, %c0_40, %c0_41] : memref<2x1x32xf32, #tpu.memory_space<vmem>>, vector<1x1x32xf32>
    %89 = vector.shape_cast %88 : vector<1x1x32xf32> to vector<1x32xf32>
    %c0_42 = arith.constant 0 : index
    %c0_43 = arith.constant 0 : index
    %c0_44 = arith.constant 0 : index
    %90 = vector.load %arg10[%c0_42, %c0_43, %c0_44] : memref<2x1x32xf32, #tpu.memory_space<vmem>>, vector<1x1x32xf32>
    %91 = vector.shape_cast %90 : vector<1x1x32xf32> to vector<1x32xf32>
    %cst_45 = arith.constant dense<0.000000e+00> : vector<8xf32>
    %92 = vector.multi_reduction <add>, %87, %cst_45 [1] : vector<8x32xf32> to vector<8xf32>
    %93 = vector.shape_cast %92 : vector<8xf32> to vector<8x1xf32>
    %cst_46 = arith.constant 3.200000e+01 : f32
    %94 = vector.broadcast %cst_46 : f32 to vector<8x1xf32>
    %95 = arith.divf %93, %94 : vector<8x1xf32>
    %96 = vector.broadcast %95 : vector<8x1xf32> to vector<8x32xf32>
    %97 = arith.subf %87, %96 : vector<8x32xf32>
    %98 = vector.broadcast %95 : vector<8x1xf32> to vector<8x32xf32>
    %99 = arith.subf %87, %98 : vector<8x32xf32>
    %100 = arith.mulf %97, %99 : vector<8x32xf32>
    %cst_47 = arith.constant dense<0.000000e+00> : vector<8xf32>
    %101 = vector.multi_reduction <add>, %100, %cst_47 [1] : vector<8x32xf32> to vector<8xf32>
    %102 = vector.shape_cast %101 : vector<8xf32> to vector<8x1xf32>
    %cst_48 = arith.constant 3.200000e+01 : f32
    %103 = vector.broadcast %cst_48 : f32 to vector<8x1xf32>
    %104 = arith.divf %102, %103 : vector<8x1xf32>
    %105 = vector.broadcast %95 : vector<8x1xf32> to vector<8x32xf32>
    %106 = arith.subf %87, %105 : vector<8x32xf32>
    %cst_49 = arith.constant 9.99999996E-13 : f32
    %107 = vector.broadcast %cst_49 : f32 to vector<8x1xf32>
    %108 = arith.addf %104, %107 : vector<8x1xf32>
    %109 = math.rsqrt %108 : vector<8x1xf32>
    %110 = vector.broadcast %109 : vector<8x1xf32> to vector<8x32xf32>
    %111 = arith.mulf %106, %110 : vector<8x32xf32>
    %112 = vector.broadcast %89 : vector<1x32xf32> to vector<8x32xf32>
    %113 = arith.mulf %111, %112 : vector<8x32xf32>
    %114 = vector.broadcast %91 : vector<1x32xf32> to vector<8x32xf32>
    %115 = arith.addf %113, %114 : vector<8x32xf32>
    %c0_50 = arith.constant 0 : index
    %c0_51 = arith.constant 0 : index
    %c0_52 = arith.constant 0 : index
    %116 = vector.load %arg11[%c0_50, %c0_51, %c0_52] : memref<2x32x64xf32, #tpu.memory_space<vmem>>, vector<1x32x64xf32>
    %117 = vector.shape_cast %116 : vector<1x32x64xf32> to vector<32x64xf32>
    %cst_53 = arith.constant dense<0.000000e+00> : vector<8x64xf32>
    %118 = tpu.matmul %115, %117, %cst_53 {dimension_numbers = #tpu.dot_dimension_numbers<[1], [0], [0], [1], [0, 0, 1, 1], [], []>} : vector<8x32xf32>, vector<32x64xf32>, vector<8x64xf32> -> vector<8x64xf32>
    %c0_54 = arith.constant 0 : index
    %c0_55 = arith.constant 0 : index
    %c0_56 = arith.constant 0 : index
    %119 = vector.load %arg12[%c0_54, %c0_55, %c0_56] : memref<2x1x64xf32, #tpu.memory_space<vmem>>, vector<1x1x64xf32>
    %120 = vector.shape_cast %119 : vector<1x1x64xf32> to vector<1x64xf32>
    %121 = vector.broadcast %120 : vector<1x64xf32> to vector<8x64xf32>
    %122 = arith.addf %118, %121 : vector<8x64xf32>
    %cst_57 = arith.constant 5.000000e-01 : f32
    %123 = vector.broadcast %cst_57 : f32 to vector<8x64xf32>
    %124 = arith.mulf %123, %122 : vector<8x64xf32>
    %cst_58 = arith.constant 4.471500e-02 : f32
    %125 = vector.broadcast %cst_58 : f32 to vector<8x64xf32>
    %126 = arith.mulf %125, %122 : vector<8x64xf32>
    %127 = arith.mulf %126, %122 : vector<8x64xf32>
    %128 = arith.mulf %127, %122 : vector<8x64xf32>
    %129 = arith.addf %122, %128 : vector<8x64xf32>
    %cst_59 = arith.constant 0.797884583 : f32
    %130 = vector.broadcast %cst_59 : f32 to vector<8x64xf32>
    %131 = arith.mulf %130, %129 : vector<8x64xf32>
    %132 = math.tanh %131 : vector<8x64xf32>
    %cst_60 = arith.constant 1.000000e+00 : f32
    %133 = vector.broadcast %cst_60 : f32 to vector<8x64xf32>
    %134 = arith.addf %133, %132 : vector<8x64xf32>
    %135 = arith.mulf %124, %134 : vector<8x64xf32>
    %c0_61 = arith.constant 0 : index
    %c0_62 = arith.constant 0 : index
    %c0_63 = arith.constant 0 : index
    %136 = vector.load %arg13[%c0_61, %c0_62, %c0_63] : memref<2x64x32xf32, #tpu.memory_space<vmem>>, vector<1x64x32xf32>
    %137 = vector.shape_cast %136 : vector<1x64x32xf32> to vector<64x32xf32>
    %cst_64 = arith.constant dense<0.000000e+00> : vector<8x32xf32>
    %138 = tpu.matmul %135, %137, %cst_64 {dimension_numbers = #tpu.dot_dimension_numbers<[1], [0], [0], [1], [0, 0, 1, 1], [], []>} : vector<8x64xf32>, vector<64x32xf32>, vector<8x32xf32> -> vector<8x32xf32>
    %c0_65 = arith.constant 0 : index
    %c0_66 = arith.constant 0 : index
    %c0_67 = arith.constant 0 : index
    %139 = vector.load %arg14[%c0_65, %c0_66, %c0_67] : memref<2x1x32xf32, #tpu.memory_space<vmem>>, vector<1x1x32xf32>
    %140 = vector.shape_cast %139 : vector<1x1x32xf32> to vector<1x32xf32>
    %141 = vector.broadcast %140 : vector<1x32xf32> to vector<8x32xf32>
    %142 = arith.addf %138, %141 : vector<8x32xf32>
    %143 = arith.addf %142, %115 : vector<8x32xf32>
    %c0_68 = arith.constant 0 : index
    %c0_69 = arith.constant 0 : index
    %c0_70 = arith.constant 0 : index
    %144 = vector.load %arg15[%c0_68, %c0_69, %c0_70] : memref<2x1x32xf32, #tpu.memory_space<vmem>>, vector<1x1x32xf32>
    %145 = vector.shape_cast %144 : vector<1x1x32xf32> to vector<1x32xf32>
    %c0_71 = arith.constant 0 : index
    %c0_72 = arith.constant 0 : index
    %c0_73 = arith.constant 0 : index
    %146 = vector.load %arg16[%c0_71, %c0_72, %c0_73] : memref<2x1x32xf32, #tpu.memory_space<vmem>>, vector<1x1x32xf32>
    %147 = vector.shape_cast %146 : vector<1x1x32xf32> to vector<1x32xf32>
    %cst_74 = arith.constant dense<0.000000e+00> : vector<8xf32>
    %148 = vector.multi_reduction <add>, %143, %cst_74 [1] : vector<8x32xf32> to vector<8xf32>
    %149 = vector.shape_cast %148 : vector<8xf32> to vector<8x1xf32>
    %cst_75 = arith.constant 3.200000e+01 : f32
    %150 = vector.broadcast %cst_75 : f32 to vector<8x1xf32>
    %151 = arith.divf %149, %150 : vector<8x1xf32>
    %152 = vector.broadcast %151 : vector<8x1xf32> to vector<8x32xf32>
    %153 = arith.subf %143, %152 : vector<8x32xf32>
    %154 = vector.broadcast %151 : vector<8x1xf32> to vector<8x32xf32>
    %155 = arith.subf %143, %154 : vector<8x32xf32>
    %156 = arith.mulf %153, %155 : vector<8x32xf32>
    %cst_76 = arith.constant dense<0.000000e+00> : vector<8xf32>
    %157 = vector.multi_reduction <add>, %156, %cst_76 [1] : vector<8x32xf32> to vector<8xf32>
    %158 = vector.shape_cast %157 : vector<8xf32> to vector<8x1xf32>
    %cst_77 = arith.constant 3.200000e+01 : f32
    %159 = vector.broadcast %cst_77 : f32 to vector<8x1xf32>
    %160 = arith.divf %158, %159 : vector<8x1xf32>
    %161 = vector.broadcast %151 : vector<8x1xf32> to vector<8x32xf32>
    %162 = arith.subf %143, %161 : vector<8x32xf32>
    %cst_78 = arith.constant 9.99999996E-13 : f32
    %163 = vector.broadcast %cst_78 : f32 to vector<8x1xf32>
    %164 = arith.addf %160, %163 : vector<8x1xf32>
    %165 = math.rsqrt %164 : vector<8x1xf32>
    %166 = vector.broadcast %165 : vector<8x1xf32> to vector<8x32xf32>
    %167 = arith.mulf %162, %166 : vector<8x32xf32>
    %168 = vector.broadcast %145 : vector<1x32xf32> to vector<8x32xf32>
    %169 = arith.mulf %167, %168 : vector<8x32xf32>
    %170 = vector.broadcast %147 : vector<1x32xf32> to vector<8x32xf32>
    %171 = arith.addf %169, %170 : vector<8x32xf32>
    %c1 = arith.constant 1 : index
    %c0_79 = arith.constant 0 : index
    %c0_80 = arith.constant 0 : index
    %172 = vector.load %arg5[%c1, %c0_79, %c0_80] : memref<2x32x96xf32, #tpu.memory_space<vmem>>, vector<1x32x96xf32>
    %173 = vector.shape_cast %172 : vector<1x32x96xf32> to vector<32x96xf32>
    %cst_81 = arith.constant dense<0.000000e+00> : vector<8x96xf32>
    %174 = tpu.matmul %171, %173, %cst_81 {dimension_numbers = #tpu.dot_dimension_numbers<[1], [0], [0], [1], [0, 0, 1, 1], [], []>} : vector<8x32xf32>, vector<32x96xf32>, vector<8x96xf32> -> vector<8x96xf32>
    %c1_82 = arith.constant 1 : index
    %c0_83 = arith.constant 0 : index
    %c0_84 = arith.constant 0 : index
    %175 = vector.load %arg6[%c1_82, %c0_83, %c0_84] : memref<2x1x96xf32, #tpu.memory_space<vmem>>, vector<1x1x96xf32>
    %176 = vector.shape_cast %175 : vector<1x1x96xf32> to vector<1x96xf32>
    %177 = vector.broadcast %176 : vector<1x96xf32> to vector<8x96xf32>
    %178 = arith.addf %174, %177 : vector<8x96xf32>
    %179 = vector.extract_strided_slice %178 {offsets = [0, 0], sizes = [8, 16], strides = [1, 1]} : vector<8x96xf32> to vector<8x16xf32>
    %180 = vector.extract_strided_slice %178 {offsets = [0, 32], sizes = [8, 16], strides = [1, 1]} : vector<8x96xf32> to vector<8x16xf32>
    %181 = vector.extract_strided_slice %178 {offsets = [0, 64], sizes = [8, 16], strides = [1, 1]} : vector<8x96xf32> to vector<8x16xf32>
    %cst_85 = arith.constant dense<0.000000e+00> : vector<8x8xf32>
    %182 = tpu.matmul %179, %180, %cst_85 {dimension_numbers = #tpu.dot_dimension_numbers<[1], [1], [0], [0], [0, 0, 1, 0], [], []>} : vector<8x16xf32>, vector<8x16xf32>, vector<8x8xf32> -> vector<8x8xf32>
    %cst_86 = arith.constant 2.500000e-01 : f32
    %183 = vector.broadcast %cst_86 : f32 to vector<8x8xf32>
    %184 = arith.mulf %182, %183 : vector<8x8xf32>
    %185 = vector.broadcast %7 : vector<1x8xf32> to vector<8x8xf32>
    %186 = arith.addf %184, %185 : vector<8x8xf32>
    %cst_87 = arith.constant dense<0xFF800000> : vector<8xf32>
    %187 = vector.multi_reduction <maximumf>, %186, %cst_87 [1] : vector<8x8xf32> to vector<8xf32>
    %188 = vector.shape_cast %187 : vector<8xf32> to vector<8x1xf32>
    %189 = vector.broadcast %188 : vector<8x1xf32> to vector<8x8xf32>
    %190 = arith.subf %186, %189 : vector<8x8xf32>
    %191 = math.exp %190 : vector<8x8xf32>
    %cst_88 = arith.constant dense<0.000000e+00> : vector<8xf32>
    %192 = vector.multi_reduction <add>, %191, %cst_88 [1] : vector<8x8xf32> to vector<8xf32>
    %193 = vector.shape_cast %192 : vector<8xf32> to vector<8x1xf32>
    %194 = tpu.reciprocal %193 {approx = true} : vector<8x1xf32> -> vector<8x1xf32>
    %195 = vector.broadcast %194 : vector<8x1xf32> to vector<8x8xf32>
    %196 = arith.mulf %191, %195 : vector<8x8xf32>
    %cst_89 = arith.constant dense<0.000000e+00> : vector<8x16xf32>
    %197 = tpu.matmul %196, %181, %cst_89 {dimension_numbers = #tpu.dot_dimension_numbers<[1], [0], [0], [1], [0, 0, 1, 1], [], []>} : vector<8x8xf32>, vector<8x16xf32>, vector<8x16xf32> -> vector<8x16xf32>
    %198 = vector.extract_strided_slice %178 {offsets = [0, 16], sizes = [8, 16], strides = [1, 1]} : vector<8x96xf32> to vector<8x16xf32>
    %199 = vector.extract_strided_slice %178 {offsets = [0, 48], sizes = [8, 16], strides = [1, 1]} : vector<8x96xf32> to vector<8x16xf32>
    %200 = vector.extract_strided_slice %178 {offsets = [0, 80], sizes = [8, 16], strides = [1, 1]} : vector<8x96xf32> to vector<8x16xf32>
    %cst_90 = arith.constant dense<0.000000e+00> : vector<8x8xf32>
    %201 = tpu.matmul %198, %199, %cst_90 {dimension_numbers = #tpu.dot_dimension_numbers<[1], [1], [0], [0], [0, 0, 1, 0], [], []>} : vector<8x16xf32>, vector<8x16xf32>, vector<8x8xf32> -> vector<8x8xf32>
    %cst_91 = arith.constant 2.500000e-01 : f32
    %202 = vector.broadcast %cst_91 : f32 to vector<8x8xf32>
    %203 = arith.mulf %201, %202 : vector<8x8xf32>
    %204 = vector.broadcast %7 : vector<1x8xf32> to vector<8x8xf32>
    %205 = arith.addf %203, %204 : vector<8x8xf32>
    %cst_92 = arith.constant dense<0xFF800000> : vector<8xf32>
    %206 = vector.multi_reduction <maximumf>, %205, %cst_92 [1] : vector<8x8xf32> to vector<8xf32>
    %207 = vector.shape_cast %206 : vector<8xf32> to vector<8x1xf32>
    %208 = vector.broadcast %207 : vector<8x1xf32> to vector<8x8xf32>
    %209 = arith.subf %205, %208 : vector<8x8xf32>
    %210 = math.exp %209 : vector<8x8xf32>
    %cst_93 = arith.constant dense<0.000000e+00> : vector<8xf32>
    %211 = vector.multi_reduction <add>, %210, %cst_93 [1] : vector<8x8xf32> to vector<8xf32>
    %212 = vector.shape_cast %211 : vector<8xf32> to vector<8x1xf32>
    %213 = tpu.reciprocal %212 {approx = true} : vector<8x1xf32> -> vector<8x1xf32>
    %214 = vector.broadcast %213 : vector<8x1xf32> to vector<8x8xf32>
    %215 = arith.mulf %210, %214 : vector<8x8xf32>
    %cst_94 = arith.constant dense<0.000000e+00> : vector<8x16xf32>
    %216 = tpu.matmul %215, %200, %cst_94 {dimension_numbers = #tpu.dot_dimension_numbers<[1], [0], [0], [1], [0, 0, 1, 1], [], []>} : vector<8x8xf32>, vector<8x16xf32>, vector<8x16xf32> -> vector<8x16xf32>
    %217 = tpu.concatenate %197, %216 in 1 : vector<8x16xf32>, vector<8x16xf32> -> vector<8x32xf32>
    %c1_95 = arith.constant 1 : index
    %c0_96 = arith.constant 0 : index
    %c0_97 = arith.constant 0 : index
    %218 = vector.load %arg7[%c1_95, %c0_96, %c0_97] : memref<2x32x32xf32, #tpu.memory_space<vmem>>, vector<1x32x32xf32>
    %219 = vector.shape_cast %218 : vector<1x32x32xf32> to vector<32x32xf32>
    %cst_98 = arith.constant dense<0.000000e+00> : vector<8x32xf32>
    %220 = tpu.matmul %217, %219, %cst_98 {dimension_numbers = #tpu.dot_dimension_numbers<[1], [0], [0], [1], [0, 0, 1, 1], [], []>} : vector<8x32xf32>, vector<32x32xf32>, vector<8x32xf32> -> vector<8x32xf32>
    %c1_99 = arith.constant 1 : index
    %c0_100 = arith.constant 0 : index
    %c0_101 = arith.constant 0 : index
    %221 = vector.load %arg8[%c1_99, %c0_100, %c0_101] : memref<2x1x32xf32, #tpu.memory_space<vmem>>, vector<1x1x32xf32>
    %222 = vector.shape_cast %221 : vector<1x1x32xf32> to vector<1x32xf32>
    %223 = vector.broadcast %222 : vector<1x32xf32> to vector<8x32xf32>
    %224 = arith.addf %220, %223 : vector<8x32xf32>
    %225 = arith.addf %224, %171 : vector<8x32xf32>
    %c1_102 = arith.constant 1 : index
    %c0_103 = arith.constant 0 : index
    %c0_104 = arith.constant 0 : index
    %226 = vector.load %arg9[%c1_102, %c0_103, %c0_104] : memref<2x1x32xf32, #tpu.memory_space<vmem>>, vector<1x1x32xf32>
    %227 = vector.shape_cast %226 : vector<1x1x32xf32> to vector<1x32xf32>
    %c1_105 = arith.constant 1 : index
    %c0_106 = arith.constant 0 : index
    %c0_107 = arith.constant 0 : index
    %228 = vector.load %arg10[%c1_105, %c0_106, %c0_107] : memref<2x1x32xf32, #tpu.memory_space<vmem>>, vector<1x1x32xf32>
    %229 = vector.shape_cast %228 : vector<1x1x32xf32> to vector<1x32xf32>
    %cst_108 = arith.constant dense<0.000000e+00> : vector<8xf32>
    %230 = vector.multi_reduction <add>, %225, %cst_108 [1] : vector<8x32xf32> to vector<8xf32>
    %231 = vector.shape_cast %230 : vector<8xf32> to vector<8x1xf32>
    %cst_109 = arith.constant 3.200000e+01 : f32
    %232 = vector.broadcast %cst_109 : f32 to vector<8x1xf32>
    %233 = arith.divf %231, %232 : vector<8x1xf32>
    %234 = vector.broadcast %233 : vector<8x1xf32> to vector<8x32xf32>
    %235 = arith.subf %225, %234 : vector<8x32xf32>
    %236 = vector.broadcast %233 : vector<8x1xf32> to vector<8x32xf32>
    %237 = arith.subf %225, %236 : vector<8x32xf32>
    %238 = arith.mulf %235, %237 : vector<8x32xf32>
    %cst_110 = arith.constant dense<0.000000e+00> : vector<8xf32>
    %239 = vector.multi_reduction <add>, %238, %cst_110 [1] : vector<8x32xf32> to vector<8xf32>
    %240 = vector.shape_cast %239 : vector<8xf32> to vector<8x1xf32>
    %cst_111 = arith.constant 3.200000e+01 : f32
    %241 = vector.broadcast %cst_111 : f32 to vector<8x1xf32>
    %242 = arith.divf %240, %241 : vector<8x1xf32>
    %243 = vector.broadcast %233 : vector<8x1xf32> to vector<8x32xf32>
    %244 = arith.subf %225, %243 : vector<8x32xf32>
    %cst_112 = arith.constant 9.99999996E-13 : f32
    %245 = vector.broadcast %cst_112 : f32 to vector<8x1xf32>
    %246 = arith.addf %242, %245 : vector<8x1xf32>
    %247 = math.rsqrt %246 : vector<8x1xf32>
    %248 = vector.broadcast %247 : vector<8x1xf32> to vector<8x32xf32>
    %249 = arith.mulf %244, %248 : vector<8x32xf32>
    %250 = vector.broadcast %227 : vector<1x32xf32> to vector<8x32xf32>
    %251 = arith.mulf %249, %250 : vector<8x32xf32>
    %252 = vector.broadcast %229 : vector<1x32xf32> to vector<8x32xf32>
    %253 = arith.addf %251, %252 : vector<8x32xf32>
    %c1_113 = arith.constant 1 : index
    %c0_114 = arith.constant 0 : index
    %c0_115 = arith.constant 0 : index
    %254 = vector.load %arg11[%c1_113, %c0_114, %c0_115] : memref<2x32x64xf32, #tpu.memory_space<vmem>>, vector<1x32x64xf32>
    %255 = vector.shape_cast %254 : vector<1x32x64xf32> to vector<32x64xf32>
    %cst_116 = arith.constant dense<0.000000e+00> : vector<8x64xf32>
    %256 = tpu.matmul %253, %255, %cst_116 {dimension_numbers = #tpu.dot_dimension_numbers<[1], [0], [0], [1], [0, 0, 1, 1], [], []>} : vector<8x32xf32>, vector<32x64xf32>, vector<8x64xf32> -> vector<8x64xf32>
    %c1_117 = arith.constant 1 : index
    %c0_118 = arith.constant 0 : index
    %c0_119 = arith.constant 0 : index
    %257 = vector.load %arg12[%c1_117, %c0_118, %c0_119] : memref<2x1x64xf32, #tpu.memory_space<vmem>>, vector<1x1x64xf32>
    %258 = vector.shape_cast %257 : vector<1x1x64xf32> to vector<1x64xf32>
    %259 = vector.broadcast %258 : vector<1x64xf32> to vector<8x64xf32>
    %260 = arith.addf %256, %259 : vector<8x64xf32>
    %cst_120 = arith.constant 5.000000e-01 : f32
    %261 = vector.broadcast %cst_120 : f32 to vector<8x64xf32>
    %262 = arith.mulf %261, %260 : vector<8x64xf32>
    %cst_121 = arith.constant 4.471500e-02 : f32
    %263 = vector.broadcast %cst_121 : f32 to vector<8x64xf32>
    %264 = arith.mulf %263, %260 : vector<8x64xf32>
    %265 = arith.mulf %264, %260 : vector<8x64xf32>
    %266 = arith.mulf %265, %260 : vector<8x64xf32>
    %267 = arith.addf %260, %266 : vector<8x64xf32>
    %cst_122 = arith.constant 0.797884583 : f32
    %268 = vector.broadcast %cst_122 : f32 to vector<8x64xf32>
    %269 = arith.mulf %268, %267 : vector<8x64xf32>
    %270 = math.tanh %269 : vector<8x64xf32>
    %cst_123 = arith.constant 1.000000e+00 : f32
    %271 = vector.broadcast %cst_123 : f32 to vector<8x64xf32>
    %272 = arith.addf %271, %270 : vector<8x64xf32>
    %273 = arith.mulf %262, %272 : vector<8x64xf32>
    %c1_124 = arith.constant 1 : index
    %c0_125 = arith.constant 0 : index
    %c0_126 = arith.constant 0 : index
    %274 = vector.load %arg13[%c1_124, %c0_125, %c0_126] : memref<2x64x32xf32, #tpu.memory_space<vmem>>, vector<1x64x32xf32>
    %275 = vector.shape_cast %274 : vector<1x64x32xf32> to vector<64x32xf32>
    %cst_127 = arith.constant dense<0.000000e+00> : vector<8x32xf32>
    %276 = tpu.matmul %273, %275, %cst_127 {dimension_numbers = #tpu.dot_dimension_numbers<[1], [0], [0], [1], [0, 0, 1, 1], [], []>} : vector<8x64xf32>, vector<64x32xf32>, vector<8x32xf32> -> vector<8x32xf32>
    %c1_128 = arith.constant 1 : index
    %c0_129 = arith.constant 0 : index
    %c0_130 = arith.constant 0 : index
    %277 = vector.load %arg14[%c1_128, %c0_129, %c0_130] : memref<2x1x32xf32, #tpu.memory_space<vmem>>, vector<1x1x32xf32>
    %278 = vector.shape_cast %277 : vector<1x1x32xf32> to vector<1x32xf32>
    %279 = vector.broadcast %278 : vector<1x32xf32> to vector<8x32xf32>
    %280 = arith.addf %276, %279 : vector<8x32xf32>
    %281 = arith.addf %280, %253 : vector<8x32xf32>
    %c1_131 = arith.constant 1 : index
    %c0_132 = arith.constant 0 : index
    %c0_133 = arith.constant 0 : index
    %282 = vector.load %arg15[%c1_131, %c0_132, %c0_133] : memref<2x1x32xf32, #tpu.memory_space<vmem>>, vector<1x1x32xf32>
    %283 = vector.shape_cast %282 : vector<1x1x32xf32> to vector<1x32xf32>
    %c1_134 = arith.constant 1 : index
    %c0_135 = arith.constant 0 : index
    %c0_136 = arith.constant 0 : index
    %284 = vector.load %arg16[%c1_134, %c0_135, %c0_136] : memref<2x1x32xf32, #tpu.memory_space<vmem>>, vector<1x1x32xf32>
    %285 = vector.shape_cast %284 : vector<1x1x32xf32> to vector<1x32xf32>
    %cst_137 = arith.constant dense<0.000000e+00> : vector<8xf32>
    %286 = vector.multi_reduction <add>, %281, %cst_137 [1] : vector<8x32xf32> to vector<8xf32>
    %287 = vector.shape_cast %286 : vector<8xf32> to vector<8x1xf32>
    %cst_138 = arith.constant 3.200000e+01 : f32
    %288 = vector.broadcast %cst_138 : f32 to vector<8x1xf32>
    %289 = arith.divf %287, %288 : vector<8x1xf32>
    %290 = vector.broadcast %289 : vector<8x1xf32> to vector<8x32xf32>
    %291 = arith.subf %281, %290 : vector<8x32xf32>
    %292 = vector.broadcast %289 : vector<8x1xf32> to vector<8x32xf32>
    %293 = arith.subf %281, %292 : vector<8x32xf32>
    %294 = arith.mulf %291, %293 : vector<8x32xf32>
    %cst_139 = arith.constant dense<0.000000e+00> : vector<8xf32>
    %295 = vector.multi_reduction <add>, %294, %cst_139 [1] : vector<8x32xf32> to vector<8xf32>
    %296 = vector.shape_cast %295 : vector<8xf32> to vector<8x1xf32>
    %cst_140 = arith.constant 3.200000e+01 : f32
    %297 = vector.broadcast %cst_140 : f32 to vector<8x1xf32>
    %298 = arith.divf %296, %297 : vector<8x1xf32>
    %299 = vector.broadcast %289 : vector<8x1xf32> to vector<8x32xf32>
    %300 = arith.subf %281, %299 : vector<8x32xf32>
    %cst_141 = arith.constant 9.99999996E-13 : f32
    %301 = vector.broadcast %cst_141 : f32 to vector<8x1xf32>
    %302 = arith.addf %298, %301 : vector<8x1xf32>
    %303 = math.rsqrt %302 : vector<8x1xf32>
    %304 = vector.broadcast %303 : vector<8x1xf32> to vector<8x32xf32>
    %305 = arith.mulf %300, %304 : vector<8x32xf32>
    %306 = vector.broadcast %283 : vector<1x32xf32> to vector<8x32xf32>
    %307 = arith.mulf %305, %306 : vector<8x32xf32>
    %308 = vector.broadcast %285 : vector<1x32xf32> to vector<8x32xf32>
    %309 = arith.addf %307, %308 : vector<8x32xf32>
    %310 = vector.extract_strided_slice %309 {offsets = [0, 0], sizes = [1, 32], strides = [1, 1]} : vector<8x32xf32> to vector<1x32xf32>
    %c0_142 = arith.constant 0 : index
    %c0_143 = arith.constant 0 : index
    %311 = vector.load %arg17[%c0_142, %c0_143] : memref<32x32xf32, #tpu.memory_space<vmem>>, vector<32x32xf32>
    %cst_144 = arith.constant dense<0.000000e+00> : vector<1x32xf32>
    %312 = tpu.matmul %310, %311, %cst_144 {dimension_numbers = #tpu.dot_dimension_numbers<[1], [0], [0], [1], [0, 0, 1, 1], [], []>} : vector<1x32xf32>, vector<32x32xf32>, vector<1x32xf32> -> vector<1x32xf32>
    %c0_145 = arith.constant 0 : index
    %c0_146 = arith.constant 0 : index
    %313 = vector.load %arg18[%c0_145, %c0_146] : memref<1x32xf32, #tpu.memory_space<vmem>>, vector<1x32xf32>
    %314 = arith.addf %312, %313 : vector<1x32xf32>
    %315 = math.tanh %314 : vector<1x32xf32>
    %c0_147 = arith.constant 0 : index
    %c0_148 = arith.constant 0 : index
    %316 = vector.load %arg19[%c0_147, %c0_148] : memref<32x128xf32, #tpu.memory_space<vmem>>, vector<32x128xf32>
    %cst_149 = arith.constant dense<0.000000e+00> : vector<1x128xf32>
    %317 = tpu.matmul %315, %316, %cst_149 {dimension_numbers = #tpu.dot_dimension_numbers<[1], [0], [0], [1], [0, 0, 1, 1], [], []>} : vector<1x32xf32>, vector<32x128xf32>, vector<1x128xf32> -> vector<1x128xf32>
    %c0_150 = arith.constant 0 : index
    %c0_151 = arith.constant 0 : index
    %318 = vector.load %arg20[%c0_150, %c0_151] : memref<1x128xf32, #tpu.memory_space<vmem>>, vector<1x128xf32>
    %319 = arith.addf %317, %318 : vector<1x128xf32>
    %c0_152 = arith.constant 0 : index
    %c0_153 = arith.constant 0 : index
    %c0_154 = arith.constant 0 : index
    %320 = vector.load %arg27[%c0_152, %c0_153, %c0_154] : memref<1x1x128xf32, #tpu.memory_space<vmem>>, vector<1x1x128xf32>
    %321 = vector.shape_cast %320 : vector<1x1x128xf32> to vector<1x128xf32>
    %322 = vector.shape_cast %319 : vector<1x128xf32> to vector<1x1x128xf32>
    tpu.vector_store %arg27[%c0_152, %c0_153, %c0_154], %322 {strides = array<i32>} : memref<1x1x128xf32, #tpu.memory_space<vmem>>, vector<1x1x128xf32>,
    %c0_155 = arith.constant 0 : index
    %c0_156 = arith.constant 0 : index
    %323 = vector.load %arg21[%c0_155, %c0_156] : memref<32x32xf32, #tpu.memory_space<vmem>>, vector<32x32xf32>
    %cst_157 = arith.constant dense<0.000000e+00> : vector<8x32xf32>
    %324 = tpu.matmul %309, %323, %cst_157 {dimension_numbers = #tpu.dot_dimension_numbers<[1], [0], [0], [1], [0, 0, 1, 1], [], []>} : vector<8x32xf32>, vector<32x32xf32>, vector<8x32xf32> -> vector<8x32xf32>
    %c0_158 = arith.constant 0 : index
    %c0_159 = arith.constant 0 : index
    %325 = vector.load %arg22[%c0_158, %c0_159] : memref<1x32xf32, #tpu.memory_space<vmem>>, vector<1x32xf32>
    %326 = vector.broadcast %325 : vector<1x32xf32> to vector<8x32xf32>
    %327 = arith.addf %324, %326 : vector<8x32xf32>
    %cst_160 = arith.constant 5.000000e-01 : f32
    %328 = vector.broadcast %cst_160 : f32 to vector<8x32xf32>
    %329 = arith.mulf %328, %327 : vector<8x32xf32>
    %cst_161 = arith.constant 4.471500e-02 : f32
    %330 = vector.broadcast %cst_161 : f32 to vector<8x32xf32>
    %331 = arith.mulf %330, %327 : vector<8x32xf32>
    %332 = arith.mulf %331, %327 : vector<8x32xf32>
    %333 = arith.mulf %332, %327 : vector<8x32xf32>
    %334 = arith.addf %327, %333 : vector<8x32xf32>
    %cst_162 = arith.constant 0.797884583 : f32
    %335 = vector.broadcast %cst_162 : f32 to vector<8x32xf32>
    %336 = arith.mulf %335, %334 : vector<8x32xf32>
    %337 = math.tanh %336 : vector<8x32xf32>
    %cst_163 = arith.constant 1.000000e+00 : f32
    %338 = vector.broadcast %cst_163 : f32 to vector<8x32xf32>
    %339 = arith.addf %338, %337 : vector<8x32xf32>
    %340 = arith.mulf %329, %339 : vector<8x32xf32>
    %c0_164 = arith.constant 0 : index
    %c0_165 = arith.constant 0 : index
    %341 = vector.load %arg23[%c0_164, %c0_165] : memref<1x32xf32, #tpu.memory_space<vmem>>, vector<1x32xf32>
    %c0_166 = arith.constant 0 : index
    %c0_167 = arith.constant 0 : index
    %342 = vector.load %arg24[%c0_166, %c0_167] : memref<1x32xf32, #tpu.memory_space<vmem>>, vector<1x32xf32>
    %cst_168 = arith.constant dense<0.000000e+00> : vector<8xf32>
    %343 = vector.multi_reduction <add>, %340, %cst_168 [1] : vector<8x32xf32> to vector<8xf32>
    %344 = vector.shape_cast %343 : vector<8xf32> to vector<8x1xf32>
    %cst_169 = arith.constant 3.200000e+01 : f32
    %345 = vector.broadcast %cst_169 : f32 to vector<8x1xf32>
    %346 = arith.divf %344, %345 : vector<8x1xf32>
    %347 = vector.broadcast %346 : vector<8x1xf32> to vector<8x32xf32>
    %348 = arith.subf %340, %347 : vector<8x32xf32>
    %349 = vector.broadcast %346 : vector<8x1xf32> to vector<8x32xf32>
    %350 = arith.subf %340, %349 : vector<8x32xf32>
    %351 = arith.mulf %348, %350 : vector<8x32xf32>
    %cst_170 = arith.constant dense<0.000000e+00> : vector<8xf32>
    %352 = vector.multi_reduction <add>, %351, %cst_170 [1] : vector<8x32xf32> to vector<8xf32>
    %353 = vector.shape_cast %352 : vector<8xf32> to vector<8x1xf32>
    %cst_171 = arith.constant 3.200000e+01 : f32
    %354 = vector.broadcast %cst_171 : f32 to vector<8x1xf32>
    %355 = arith.divf %353, %354 : vector<8x1xf32>
    %356 = vector.broadcast %346 : vector<8x1xf32> to vector<8x32xf32>
    %357 = arith.subf %340, %356 : vector<8x32xf32>
    %cst_172 = arith.constant 9.99999996E-13 : f32
    %358 = vector.broadcast %cst_172 : f32 to vector<8x1xf32>
    %359 = arith.addf %355, %358 : vector<8x1xf32>
    %360 = math.rsqrt %359 : vector<8x1xf32>
    %361 = vector.broadcast %360 : vector<8x1xf32> to vector<8x32xf32>
    %362 = arith.mulf %357, %361 : vector<8x32xf32>
    %363 = vector.broadcast %341 : vector<1x32xf32> to vector<8x32xf32>
    %364 = arith.mulf %362, %363 : vector<8x32xf32>
    %365 = vector.broadcast %342 : vector<1x32xf32> to vector<8x32xf32>
    %366 = arith.addf %364, %365 : vector<8x32xf32>
    %c0_173 = arith.constant 0 : index
    %c0_174 = arith.constant 0 : index
    %367 = vector.load %arg25[%c0_173, %c0_174] : memref<32x64xf32, #tpu.memory_space<vmem>>, vector<32x64xf32>
    %cst_175 = arith.constant dense<0.000000e+00> : vector<8x64xf32>
    %368 = tpu.matmul %366, %367, %cst_175 {dimension_numbers = #tpu.dot_dimension_numbers<[1], [0], [0], [1], [0, 0, 1, 1], [], []>} : vector<8x32xf32>, vector<32x64xf32>, vector<8x64xf32> -> vector<8x64xf32>
    %c0_176 = arith.constant 0 : index
    %c0_177 = arith.constant 0 : index
    %369 = vector.load %arg26[%c0_176, %c0_177] : memref<1x64xf32, #tpu.memory_space<vmem>>, vector<1x64xf32>
    %370 = vector.broadcast %369 : vector<1x64xf32> to vector<8x64xf32>
    %371 = arith.addf %368, %370 : vector<8x64xf32>
    %c0_178 = arith.constant 0 : index
    %c0_179 = arith.constant 0 : index
    %c0_180 = arith.constant 0 : index
    %372 = vector.load %arg28[%c0_178, %c0_179, %c0_180] : memref<1x8x64xf32, #tpu.memory_space<vmem>>, vector<1x8x64xf32>
    %373 = vector.shape_cast %372 : vector<1x8x64xf32> to vector<8x64xf32>
    %374 = vector.shape_cast %371 : vector<8x64xf32> to vector<1x8x64xf32>
    tpu.vector_store %arg28[%c0_178, %c0_179, %c0_180], %374 {strides = array<i32>} : memref<1x8x64xf32, #tpu.memory_space<vmem>>, vector<1x8x64xf32>,
    return
  }
  func.func @transform_0(%arg0: i32) -> (i32, i32, i32) {
    %c0_i32 = arith.constant 0 : i32
    %c0_i32_0 = arith.constant 0 : i32
    %c0_i32_1 = arith.constant 0 : i32
    return %arg0, %c0_i32, %c0_i32_0 : i32, i32, i32
  }
  func.func @transform_1(%arg0: i32) -> (i32, i32, i32) {
    %c0_i32 = arith.constant 0 : i32
    %c0_i32_0 = arith.constant 0 : i32
    %c0_i32_1 = arith.constant 0 : i32
    return %arg0, %c0_i32, %c0_i32_0 : i32, i32, i32
  }
  func.func @transform_2(%arg0: i32) -> (i32, i32) {
    %c0_i32 = arith.constant 0 : i32
    %c0_i32_0 = arith.constant 0 : i32
    %c0_i32_1 = arith.constant 0 : i32
    return %c0_i32, %c0_i32_0 : i32, i32
  }
  func.func @transform_3(%arg0: i32) -> (i32, i32) {
    %c0_i32 = arith.constant 0 : i32
    %c0_i32_0 = arith.constant 0 : i32
    %c0_i32_1 = arith.constant 0 : i32
    return %c0_i32, %c0_i32_0 : i32, i32
  }
  func.func @transform_4(%arg0: i32) -> (i32, i32, i32) {
    %c0_i32 = arith.constant 0 : i32
    %c0_i32_0 = arith.constant 0 : i32
    %c0_i32_1 = arith.constant 0 : i32
    %c0_i32_2 = arith.constant 0 : i32
    return %c0_i32, %c0_i32_0, %c0_i32_1 : i32, i32, i32
  }
  func.func @transform_5(%arg0: i32) -> (i32, i32, i32) {
    %c0_i32 = arith.constant 0 : i32
    %c0_i32_0 = arith.constant 0 : i32
    %c0_i32_1 = arith.constant 0 : i32
    %c0_i32_2 = arith.constant 0 : i32
    return %c0_i32, %c0_i32_0, %c0_i32_1 : i32, i32, i32
  }
  func.func @transform_6(%arg0: i32) -> (i32, i32, i32) {
    %c0_i32 = arith.constant 0 : i32
    %c0_i32_0 = arith.constant 0 : i32
    %c0_i32_1 = arith.constant 0 : i32
    %c0_i32_2 = arith.constant 0 : i32
    return %c0_i32, %c0_i32_0, %c0_i32_1 : i32, i32, i32
  }
  func.func @transform_7(%arg0: i32) -> (i32, i32, i32) {
    %c0_i32 = arith.constant 0 : i32
    %c0_i32_0 = arith.constant 0 : i32
    %c0_i32_1 = arith.constant 0 : i32
    %c0_i32_2 = arith.constant 0 : i32
    return %c0_i32, %c0_i32_0, %c0_i32_1 : i32, i32, i32
  }
  func.func @transform_8(%arg0: i32) -> (i32, i32, i32) {
    %c0_i32 = arith.constant 0 : i32
    %c0_i32_0 = arith.constant 0 : i32
    %c0_i32_1 = arith.constant 0 : i32
    %c0_i32_2 = arith.constant 0 : i32
    return %c0_i32, %c0_i32_0, %c0_i32_1 : i32, i32, i32
  }
  func.func @transform_9(%arg0: i32) -> (i32, i32, i32) {
    %c0_i32 = arith.constant 0 : i32
    %c0_i32_0 = arith.constant 0 : i32
    %c0_i32_1 = arith.constant 0 : i32
    %c0_i32_2 = arith.constant 0 : i32
    return %c0_i32, %c0_i32_0, %c0_i32_1 : i32, i32, i32
  }
  func.func @transform_10(%arg0: i32) -> (i32, i32, i32) {
    %c0_i32 = arith.constant 0 : i32
    %c0_i32_0 = arith.constant 0 : i32
    %c0_i32_1 = arith.constant 0 : i32
    %c0_i32_2 = arith.constant 0 : i32
    return %c0_i32, %c0_i32_0, %c0_i32_1 : i32, i32, i32
  }
  func.func @transform_11(%arg0: i32) -> (i32, i32, i32) {
    %c0_i32 = arith.constant 0 : i32
    %c0_i32_0 = arith.constant 0 : i32
    %c0_i32_1 = arith.constant 0 : i32
    %c0_i32_2 = arith.constant 0 : i32
    return %c0_i32, %c0_i32_0, %c0_i32_1 : i32, i32, i32
  }
  func.func @transform_12(%arg0: i32) -> (i32, i32, i32) {
    %c0_i32 = arith.constant 0 : i32
    %c0_i32_0 = arith.constant 0 : i32
    %c0_i32_1 = arith.constant 0 : i32
    %c0_i32_2 = arith.constant 0 : i32
    return %c0_i32, %c0_i32_0, %c0_i32_1 : i32, i32, i32
  }
  func.func @transform_13(%arg0: i32) -> (i32, i32, i32) {
    %c0_i32 = arith.constant 0 : i32
    %c0_i32_0 = arith.constant 0 : i32
    %c0_i32_1 = arith.constant 0 : i32
    %c0_i32_2 = arith.constant 0 : i32
    return %c0_i32, %c0_i32_0, %c0_i32_1 : i32, i32, i32
  }
  func.func @transform_14(%arg0: i32) -> (i32, i32, i32) {
    %c0_i32 = arith.constant 0 : i32
    %c0_i32_0 = arith.constant 0 : i32
    %c0_i32_1 = arith.constant 0 : i32
    %c0_i32_2 = arith.constant 0 : i32
    return %c0_i32, %c0_i32_0, %c0_i32_1 : i32, i32, i32
  }
  func.func @transform_15(%arg0: i32) -> (i32, i32, i32) {
    %c0_i32 = arith.constant 0 : i32
    %c0_i32_0 = arith.constant 0 : i32
    %c0_i32_1 = arith.constant 0 : i32
    %c0_i32_2 = arith.constant 0 : i32
    return %c0_i32, %c0_i32_0, %c0_i32_1 : i32, i32, i32
  }
  func.func @transform_16(%arg0: i32) -> (i32, i32) {
    %c0_i32 = arith.constant 0 : i32
    %c0_i32_0 = arith.constant 0 : i32
    %c0_i32_1 = arith.constant 0 : i32
    return %c0_i32, %c0_i32_0 : i32, i32
  }
  func.func @transform_17(%arg0: i32) -> (i32, i32) {
    %c0_i32 = arith.constant 0 : i32
    %c0_i32_0 = arith.constant 0 : i32
    %c0_i32_1 = arith.constant 0 : i32
    return %c0_i32, %c0_i32_0 : i32, i32
  }
  func.func @transform_18(%arg0: i32) -> (i32, i32) {
    %c0_i32 = arith.constant 0 : i32
    %c0_i32_0 = arith.constant 0 : i32
    %c0_i32_1 = arith.constant 0 : i32
    return %c0_i32, %c0_i32_0 : i32, i32
  }
  func.func @transform_19(%arg0: i32) -> (i32, i32) {
    %c0_i32 = arith.constant 0 : i32
    %c0_i32_0 = arith.constant 0 : i32
    %c0_i32_1 = arith.constant 0 : i32
    return %c0_i32, %c0_i32_0 : i32, i32
  }
  func.func @transform_20(%arg0: i32) -> (i32, i32) {
    %c0_i32 = arith.constant 0 : i32
    %c0_i32_0 = arith.constant 0 : i32
    %c0_i32_1 = arith.constant 0 : i32
    return %c0_i32, %c0_i32_0 : i32, i32
  }
  func.func @transform_21(%arg0: i32) -> (i32, i32) {
    %c0_i32 = arith.constant 0 : i32
    %c0_i32_0 = arith.constant 0 : i32
    %c0_i32_1 = arith.constant 0 : i32
    return %c0_i32, %c0_i32_0 : i32, i32
  }
  func.func @transform_22(%arg0: i32) -> (i32, i32) {
    %c0_i32 = arith.constant 0 : i32
    %c0_i32_0 = arith.constant 0 : i32
    %c0_i32_1 = arith.constant 0 : i32
    return %c0_i32, %c0_i32_0 : i32, i32
  }
  func.func @transform_23(%arg0: i32) -> (i32, i32) {
    %c0_i32 = arith.constant 0 : i32
    %c0_i32_0 = arith.constant 0 : i32
    %c0_i32_1 = arith.constant 0 : i32
    return %c0_i32, %c0_i32_0 : i32, i32
  }
  func.func @transform_24(%arg0: i32) -> (i32, i32) {
    %c0_i32 = arith.constant 0 : i32
    %c0_i32_0 = arith.constant 0 : i32
    %c0_i32_1 = arith.constant 0 : i32
    return %c0_i32, %c0_i32_0 : i32, i32
  }
  func.func @transform_25(%arg0: i32) -> (i32, i32) {
    %c0_i32 = arith.constant 0 : i32
    %c0_i32_0 = arith.constant 0 : i32
    %c0_i32_1 = arith.constant 0 : i32
    return %c0_i32, %c0_i32_0 : i32, i32
  }
  func.func @transform_26(%arg0: i32) -> (i32, i32, i32) {
    %c0_i32 = arith.constant 0 : i32
    %c0_i32_0 = arith.constant 0 : i32
    %c0_i32_1 = arith.constant 0 : i32
    return %arg0, %c0_i32, %c0_i32_0 : i32, i32, i32
  }
  func.func @transform_27(%arg0: i32) -> (i32, i32, i32) {
    %c0_i32 = arith.constant 0 : i32
    %c0_i32_0 = arith.constant 0 : i32
    %c0_i32_1 = arith.constant 0 : i32
    return %arg0, %c0_i32, %c0_i32_0 : i32, i32, i32
  }
}

</mosaic_0001>

<bundles_post_ra>
// kernel: udalm_forward.1
= control target key start
LH: loop header
LB: loop body
LE: loop exit
PB: predicated region body
PF: predicated region fallthrough
CT: control target
= control target key end

     0   :  { %s3848_s0 = inlined_call_operand.vmem [shape: f32[4,8,32], index: 0, kind: input, shape index: {}]   ;;  %s3849_s1 = inlined_call_operand.vmem [shape: f32[4,1,8], index: 1, kind: input, shape index: {}]   ;;  %s3850_s2 = inlined_call_operand.vmem [shape: f32[1,32], index: 2, kind: input, shape index: {}]   ;;  %s3851_s3 = inlined_call_operand.vmem [shape: f32[1,32], index: 3, kind: input, shape index: {}]   ;;  %s3852_s4 = inlined_call_operand.vmem [shape: f32[2,32,96], index: 4, kind: input, shape index: {}]   ;;  %s3853_s5 = inlined_call_operand.vmem [shape: f32[2,1,96], index: 5, kind: input, shape index: {}]   ;;  %s3854_s6 = inlined_call_operand.vmem [shape: f32[2,32,32], index: 6, kind: input, shape index: {}]   ;;  %s3855_s7 = inlined_call_operand.vmem [shape: f32[2,1,32], index: 7, kind: input, shape index: {}]   ;;  %s3856_s8 = inlined_call_operand.vmem [shape: f32[2,1,32], index: 8, kind: input, shape index: {}]   ;;  %s3857_s9 = inlined_call_operand.vmem [shape: f32[2,1,32], index: 9, kind: input, shape index: {}]   ;;  %s3858_s10 = inlined_call_operand.vmem [shape: f32[2,32,64], index: 10, kind: input, shape index: {}]   ;;  %s3859_s11 = inlined_call_operand.vmem [shape: f32[2,1,64], index: 11, kind: input, shape index: {}]   ;;  %s3860_s12 = inlined_call_operand.vmem [shape: f32[2,64,32], index: 12, kind: input, shape index: {}]   ;;  %s3861_s13 = inlined_call_operand.vmem [shape: f32[2,1,32], index: 13, kind: input, shape index: {}]   ;;  %s3862_s14 = inlined_call_operand.vmem [shape: f32[2,1,32], index: 14, kind: input, shape index: {}]   ;;  %s3863_s15 = inlined_call_operand.vmem [shape: f32[2,1,32], index: 15, kind: input, shape index: {}]   ;;  %s3864_s16 = inlined_call_operand.vmem [shape: f32[32,32], index: 16, kind: input, shape index: {}]   ;;  %s3865_s17 = inlined_call_operand.vmem [shape: f32[1,32], index: 17, kind: input, shape index: {}]   ;;  %s3866_s18 = inlined_call_operand.vmem [shape: f32[32,128], index: 18, kind: input, shape index: {}]   ;;  %s3867_s19 = inlined_call_operand.vmem [shape: f32[1,128], index: 19, kind: input, shape index: {}]   ;;  %s3868_s20 = inlined_call_operand.vmem [shape: f32[32,32], index: 20, kind: input, shape index: {}]   ;;  %s3869_s21 = inlined_call_operand.vmem [shape: f32[1,32], index: 21, kind: input, shape index: {}]   ;;  %s3870_s22 = inlined_call_operand.vmem [shape: f32[1,32], index: 22, kind: input, shape index: {}]   ;;  %s3871_s23 = inlined_call_operand.vmem [shape: f32[1,32], index: 23, kind: input, shape index: {}]   ;;  %s3872_s24 = inlined_call_operand.vmem [shape: f32[32,64], index: 24, kind: input, shape index: {}]   ;;  %s3873_s25 = inlined_call_operand.vmem [shape: f32[1,64], index: 25, kind: input, shape index: {}]   ;;  %s3874_s26 = inlined_call_operand.vmem [shape: f32[4,1,128], index: 26, kind: output, shape index: {0}]   ;;  %s3875_s27 = inlined_call_operand.vmem [shape: f32[4,8,64], index: 27, kind: output, shape index: {1}]  }
   0x1   :  { %3896 = sst [smem:[#allocation3_spill]] %s3848_s0 }
   0x2   :  { %3897 = sst [smem:[#allocation4_spill]] %s3849_s1 }
   0x3   :  { %3898 = sst [smem:[#allocation5_spill]] %s3850_s2 }
   0x4   :  { %3899 = sst [smem:[#allocation6_spill]] %s3851_s3 }
   0x5   :  { %3900 = sst [smem:[#allocation7_spill]] %s3852_s4 }
   0x6   :  { %3901 = sst [smem:[#allocation8_spill]] %s3853_s5 }
   0x7   :  { %3902 = sst [smem:[#allocation9_spill]] %s3854_s6 }
   0x8   :  { %3903 = sst [smem:[#allocation10_spill]] %s3855_s7  ;;  %s3399_s7 = smov 0  }
   0x9   :  { %3904 = sst [smem:[#allocation11_spill]] %s3856_s8 }
   0xa   :  { %3905 = sst [smem:[#allocation12_spill]] %s3857_s9 }
   0xb   :  { %3906 = sst [smem:[#allocation13_spill]] %s3858_s10 }
   0xc   :  { %3907 = sst [smem:[#allocation14_spill]] %s3859_s11 }
   0xd   :  { %3908 = sst [smem:[#allocation15_spill]] %s3873_s25 }
   0xe   :  { %3909 = sst [smem:[#allocation16_spill]] %s3875_s27 }
   0xf LB: > { %3910 = sst [smem:[#allocation2_spill]] %s3249_s7  ;;  %s2836_s4 = sadd.s32 4294967295, %s3249_s7   ;;  %s3249_s7 = sphi %s3399_s7, %s38_s7  }
  0x10   : > { %p2840_p0 = scmp.ge.s32.totalorder %s3249_s7, 1  ;;  %p747_p1 = scmp.lt.s32.totalorder %s3249_s7, 5 }
  0x12   : > { %p748_p2 = pnand %p2840_p0, %p747_p1 }
  0x13   : > { %p823_p3 = scmp.lt.s32.totalorder (!%p748_p2), %s2836_s4, 3  ;;  %s3911_s5 = sld [smem:[#allocation3_spill]] (!%p748_p2) }
  0x14   : > { %751 = sbr.rel (%p748_p2) target bundleno = 5800 (0x16a8), region = 124  ;;  %s3912_s29 = sld [smem:[#allocation7_spill]] (!%p748_p2) }
  0x15   : > { %s3914_s1 = sld [smem:[#allocation6_spill]] (!%p748_p2)  ;;  %s3888_s3 = smov (!%p748_p2), 112  }
  0x16   : > { %s3915_s2 = sld [smem:[#allocation8_spill]] (!%p748_p2)  ;;  %s3889_s30 = smov (!%p748_p2), 96  }
  0x17   : > { %s3890_s9 = smov (!%p748_p2), 80   ;;  %s3916_s0 = sld [smem:[#allocation4_spill]] (!%p748_p2) }
  0x18   : > { %s3886_s6 = smov (!%p748_p2), 64   ;;  %s3919_s11 = sld [smem:[#allocation13_spill]] (!%p748_p2) }
  0x19   : > { %s3935_s4 = smov (!%p823_p3, %s2836_s4), 3  ;;  %vm843_vm0 = vcmask 261120   ;;  %v3251_v8 = vmov 0.0   ;;  %vm3252_vm1 = vmmov 0   ;;  %vm959_vm2 = vcmask 130048   ;;  %s3922_s7 = sld [smem:[#allocation14_spill]] }
  0x1a   : > { %s3884_s8 = sshll.u32 %s3935_s4, 3  ;;  %v875_v7 = vld [vmem:[%s3912_s29 + $0x18] sm:$0xff]  ;;  %3003 = vmatprep.subr.mxu0 %v3251_v8  ;;  %v874_v9 = vld [vmem:[%s3912_s29 + $0x10] sm:$0xff]  ;;  %3011 = vmatprep.mubr.msk.f32.mxu0 %vm3252_vm1, %v3251_v8  ;;  %v873_v10 = vld [vmem:[%s3912_s29 + $0x8] sm:$0xff]  ;;  %v1036_v28 = vlaneseq  ;;  %vm1042_vm3 = vcmask 64512   ;;  %vm1524_vm4 = vcmask 523264  }
  0x1b   : > { %s826_s28 = scalar_lea.vmem %s3911_s5, %s3884_s8  ;;  %3004 = vmatpush3.msra.mxu0 %v875_v7  ;;  %3014 = vmatprep.subr.mxu1 %v3251_v8  ;;  %v872_v11 = vld [vmem:[%s3912_s29] sm:$0xff]  ;;  %s3887_s5 = smov 16  }
  0x1c   : > { %v837_v0 = vld [vmem:[%s826_s28] sm:$0xff]  ;;  %3005 = vmatprep.subr.mxu0 %v3251_v8  ;;  %3016 = vmatprep.mubr.msk.f32.mxu1 %vm3252_vm1, %v3251_v8  ;;  %s3913_s28 = sld [smem:[#allocation5_spill]]  ;;  %v1037_v31 = vshrl.u32 %v1036_v28, 7  ;;  %s3927_s8 = smov 64  }
  0x1d   : > { %v844_v1 = vsel %vm843_vm0, %v837_v0, 0.0  ;;  %3006 = vmatpush3.msra.mxu0 %v874_v9  ;;  %v2844_v18 = vld [vmem:[%s3914_s1] ss:$0 sm:$0xff]  ;;  %s829_s10 = scalar_lea.vmem %s3916_s0, %s3935_s4  ;;  %s3885_s1 = smov 48  }
  0x1e   : > { %845 = vadd.xlane.f32.xlu0 %v844_v1  ;;  %3007 = vmatprep.subr.mxu0 %v3251_v8  ;;  %v2845_v21 = vld [vmem:[%s3915_s2] ss:$0 sm:$0xff]  ;;  %v1038_v33 = vsub.s32 0, %v1037_v31  ;;  %s3920_s0 = sld [smem:[#allocation11_spill]]  ;;  %s3929_s27 = smov 16  }
  0x1f   : > { %3008 = vmatpush3.msra.mxu0 %v873_v10  ;;  %v838_v29 = vld [vmem:[%s829_s10] sm:$0x1]  ;;  %s3926_s10 = smov 112  }
  0x20   : > { %3009 = vmatprep.subr.mxu0 %v3251_v8  ;;  %v839_v30 = vsub.f32 1.0, %v838_v29 }
  0x21   : > { %3010 = vmatpush3.msra.mxu0 %v872_v11 }
  0x22   : > { %3024 = vmatprep.subr.mxu0 %v3251_v8  ;;  %v2843_v16 = vld [vmem:[%s3913_s28] ss:$0 sm:$0xff]  ;;  %v840_v32 = vmul.f32 -1e+09, %v839_v30  ;;  %s3917_s28 = sld [smem:[#allocation9_spill]] }
  0x24   : > { %v3471_v34 = vrot.slane %v840_v32, %v1038_v33  ;;  %v2855_v29 = vld [vmem:[%s3920_s0] ss:$0 sm:$0xff] }
  0x28   : > { %v1305_v63 = vld [vmem:[%s3917_s28 + $0x18] sm:$0xff]  ;;  %v1303_v1 = vld [vmem:[%s3917_s28 + $0x8] sm:$0xff] }
  0xa7   : > { %v846_v2 = vpop.xlane.xlu0 %845 }
  0xa8   : > { %v848_v3 = vmul.f32 0.03125, %v846_v2  ;;  %v1302_v2 = vld [vmem:[%s3917_s28] sm:$0xff] }
  0xaa   : > { %v849_v4 = vsub.f32 %v837_v0, %v848_v3  ;;  %v1304_v0 = vld [vmem:[%s3917_s28 + $0x10] sm:$0xff] }
  0xac   : > { %v850_v5 = vmul.f32 %v849_v4, %v849_v4 }
  0xae   : > { %v851_v6 = vsel %vm843_vm0, %v850_v5, 0.0 }
  0xaf   : > { %852 = vadd.xlane.f32.xlu0 %v851_v6 }
 0x138   : > { %v853_v12 = vpop.xlane.xlu0 %852 }
 0x139   : > { %v854_v13 = vmul.f32 0.03125, %v853_v12 }
 0x13b   : > { %v855_v14 = vadd.f32 1e-12, %v854_v13 }
 0x13d   : > { %3207 = vrsqrt.f32 %v855_v14 }
 0x14a   : > { %v3208_v15 = vpop.eup %3207 }
 0x14b   : > { %v857_v17 = vmul.f32 %v3208_v15, %v849_v4 }
 0x14d   : > { %v864_v19 = vmul.f32 %v2843_v16, %v857_v17 }
 0x14f   : > { %v3445_v20 = vadd.f32 %v2844_v18, %v864_v19 }
 0x151   : > { %3012 = vmatmul.mubr.msk.f32.vlgmr.msra.gmra.mxu0 %vm843_vm0, %v3445_v20 }
 0x152   : > { %3026 = vmatprep.mubr.msk.f32.mxu0 %vm3252_vm1, %v3251_v8 }
 0x211   : > { %v952_v22 = vpop.f32.mrf.mxu0 }
 0x212   : > { %v953_v23 = vadd.f32 %v2845_v21, %v952_v22  ;;  %v1419_v22 = vld [vmem:[%s3919_s11 + $0x18] sm:$0xff] }
 0x213   : > { %v3013_v24 = vpop.f32.mrf.mxu0 }
 0x214   : > { %1130 = vrot.lane.b32.xlu0 %v953_v23, %s3888_s3  ;;  %957 = vrot.lane.b32.xlu1 %v953_v23, %s3889_s30  ;;  %v1416_v24 = vld [vmem:[%s3919_s11] sm:$0xff]  ;;  %s3921_s30 = sld [smem:[#allocation12_spill]]  ;;  %s3924_s3 = smov 80  }
 0x218   : > { %1132 = vrot.lane.b32.xlu1 %v953_v23, %s3890_s9  ;;  %s3928_s9 = smov 48  }
 0x21a   : > { %v2856_v31 = vld [vmem:[%s3921_s30] ss:$0 sm:$0xff] }
 0x286   : > { %v958_v25 = vpop.permute.xlu1 %957  ;;  %v1131_v27 = vpop.permute.xlu0 %1130 }
 0x287   : > { %3015 = vmatpush3.xpose.msk.msra.mxu1 %vm959_vm2, %v958_v25 }
 0x288   : > { %3019 = vmatprep.subr.mxu1 %v3251_v8 }
 0x28a   : > { %3017 = vmatmul.mubr.msk.f32.vlgmr.msra.gmra.mxu1 %vm959_vm2, %v953_v23  ;;  %v1133_v26 = vpop.permute.xlu1 %1132 }
 0x28b   : > { %3025 = vmatpush3.xpose.msk.msra.mxu0 %vm959_vm2, %v1133_v26  ;;  %3021 = vmatprep.mubr.msk.f32.mxu1 %vm3252_vm1, %v3251_v8 }
 0x28c   : > { %3034 = vmatprep.subr.mxu0 %v3251_v8 }
 0x28e   : > { %3027 = vmatmul.mubr.msk.f32.vlgmr.msra.gmra.mxu0 %vm959_vm2, %v1131_v27 }
 0x28f   : > { %3042 = vmatprep.mubr.msk.f32.mxu0 %vm3252_vm1, %v3251_v8  ;;  %3035 = vmatpush3.msra.mxu0 %v1305_v63 }
 0x290   : > { %3036 = vmatprep.subr.mxu0 %v3251_v8 }
 0x291   : > { %3037 = vmatpush3.msra.mxu0 %v1304_v0 }
 0x292   : > { %3038 = vmatprep.subr.mxu0 %v3251_v8 }
 0x293   : > { %3039 = vmatpush3.msra.mxu0 %v1303_v1 }
 0x294   : > { %3040 = vmatprep.subr.mxu0 %v3251_v8 }
 0x295   : > { %3041 = vmatpush3.msra.mxu0 %v1302_v2 }
 0x296   : > { %3056 = vmatprep.subr.mxu0 %v3251_v8 }
 0x34a   : > { %v1030_v35 = vpop.f32.mrf.mxu1 }
 0x34b   : > { %v1034_v36 = vmul.f32 0.25, %v1030_v35  ;;  %v1516_v35 = vld [vmem:[%s3860_s12 + $0x38] sm:$0xff] }
 0x34c   : > { %v3018_v37 = vpop.f32.mrf.mxu1 }
 0x34d   : > { %v1041_v38 = vadd.f32 %v3471_v34, %v1034_v36  ;;  %v1515_v36 = vld [vmem:[%s3860_s12 + $0x30] sm:$0xff]  ;;  %v1514_v37 = vld [vmem:[%s3860_s12 + $0x28] sm:$0xff] }
 0x34e   : > { %v1204_v39 = vpop.f32.mrf.mxu0 }
 0x34f   : > { %v1208_v40 = vmul.f32 0.25, %v1204_v39  ;;  %v1043_v41 = vsel %vm1042_vm3, %v1041_v38, -inf  ;;  %v1512_v39 = vld [vmem:[%s3860_s12 + $0x18] sm:$0xff] }
 0x350   : > { %1044 = vmax.xlane.f32.xlu1 %v1043_v41  ;;  %v3028_v42 = vpop.f32.mrf.mxu0  ;;  %v1510_v41 = vld [vmem:[%s3860_s12 + $0x8] sm:$0xff] }
 0x351   : > { %v1209_v43 = vadd.f32 %v1208_v40, %v3471_v34  ;;  %v1511_v40 = vld [vmem:[%s3860_s12 + $0x10] sm:$0xff]  ;;  %v1509_v42 = vld [vmem:[%s3860_s12] sm:$0xff] }
 0x353   : > { %v1210_v44 = vsel %vm1042_vm3, %v1209_v43, -inf }
 0x354   : > { %1211 = vmax.xlane.f32.xlu0 %v1210_v44 }
 0x36a   : > { %1221 = vrot.lane.b32.xlu0 %v953_v23, %s3885_s1  ;;  %s3923_s1 = smov %s3922_s7 }
 0x3d9   : > { %v1045_v45 = vpop.xlane.xlu1 %1044 }
 0x3da   : > { %v1046_v46 = vsub.f32 %v1041_v38, %v1045_v45  ;;  %v1513_v38 = vld [vmem:[%s3860_s12 + $0x20] sm:$0xff] }
 0x3dc   : > { %v1047_v47 = vmul.f32 1.442695, %v1046_v46 }
 0x3dd   : > { %v1212_v48 = vpop.xlane.xlu0 %1211 }
 0x3de   : > { %3209 = vpow2.f32 %v1047_v47  ;;  %v1213_v49 = vsub.f32 %v1209_v43, %v1212_v48  ;;  %v2857_v43 = vld [vmem:[%s3922_s7] ss:$0 sm:$0xff] }
 0x3e0   : > { %v1214_v50 = vmul.f32 1.442695, %v1213_v49 }
 0x3e1   : > { %v1222_v60 = vpop.permute.xlu0 %1221 }
 0x3e2   : > { %3211 = vpow2.f32 %v1214_v50 }
 0x3eb   : > { %v3210_v51 = vpop.eup %3209 }
 0x3ec   : > { %v1049_v52 = vsel %vm1042_vm3, %v3210_v51, 0.0 }
 0x3ed   : > { %1050 = vadd.xlane.f32.xlu1 %v1049_v52 }
 0x3ef   : > { %v3212_v53 = vpop.eup %3211 }
 0x3f0   : > { %v1216_v54 = vsel %vm1042_vm3, %v3212_v53, 0.0 }
 0x3f1   : > { %1217 = vadd.xlane.f32.xlu1 %v1216_v54 }
 0x402   : > { %1054 = vrot.lane.b32.xlu1 %v953_v23, %s3886_s6  ;;  %s3918_s6 = sld [smem:[#allocation10_spill]]  ;;  %v1418_v23 = vld [vmem:[%s3919_s11 + $0x10] sm:$0xff] }
 0x408   : > { %v2853_v10 = vld [vmem:[%s3918_s6] ss:$0 sm:$0xff] }
 0x476   : > { %v1051_v55 = vpop.xlane.xlu1 %1050 }
 0x477   : > { %3213 = vrcp.f32 %v1051_v55 }
 0x47a   : > { %v1218_v56 = vpop.xlane.xlu1 %1217 }
 0x47b   : > { %3215 = vrcp.f32 %v1218_v56  ;;  %v2859_v56 = vld [vmem:[%s3861_s13] ss:$0 sm:$0xff] }
 0x47e   : > { %v1055_v57 = vpop.permute.xlu1 %1054 }
 0x47f   : > { %3020 = vmatpush3.msra.mxu1 %v1055_v57 }
 0x480   : > { %3029 = vmatprep.subr.mxu1 %v3251_v8 }
 0x484   : > { %v3214_v58 = vpop.eup %3213 }
 0x485   : > { %v1053_v59 = vmul.f32 %v3214_v58, %v3210_v51 }
 0x487   : > { %3022 = vmatmul.mubr.msk.f32.vlgmr.msra.gmra.mxu1 %vm1042_vm3, %v1053_v59 }
 0x488   : > { %v3216_v61 = vpop.eup %3215  ;;  %3030 = vmatpush3.msra.mxu1 %v1222_v60  ;;  %3031 = vmatprep.mubr.msk.f32.mxu1 %vm3252_vm1, %v3251_v8 }
 0x489   : > { %v1220_v62 = vmul.f32 %v3216_v61, %v3212_v53  ;;  %3045 = vmatprep.subr.mxu1 %v3251_v8 }
 0x48b   : > { %3032 = vmatmul.mubr.msk.f32.vlgmr.msra.gmra.mxu1 %vm1042_vm3, %v1220_v62 }
 0x48c   : > { %3053 = vmatprep.mubr.msk.f32.mxu1 %vm3252_vm1, %v3251_v8  ;;  %3046 = vmatpush3.msra.mxu1 %v1419_v22 }
 0x48d   : > { %3047 = vmatprep.subr.mxu1 %v3251_v8 }
 0x48e   : > { %3048 = vmatpush3.msra.mxu1 %v1418_v23 }
 0x48f   : > { %3049 = vmatprep.subr.mxu1 %v3251_v8 }
 0x547   : > { %v1126_v3 = vpop.f32.mrf.mxu1 }
 0x549   : > { %v3023_v4 = vpop.f32.mrf.mxu1 }
 0x54a   : > { %v2865_v4 = vld [vmem:[%s3912_s29 + $0x30] sm:$0xff] }
 0x54b   : > { %v1293_v5 = vpop.f32.mrf.mxu1 }
 0x54c   : > { %1298 = vrot.lane.b32.xlu1 %v1293_v5, %s3887_s5  ;;  %v2864_v5 = vld [vmem:[%s3912_s29 + $0x28] sm:$0xff]  ;;  %s3925_s5 = smov 96  }
 0x54d   : > { %v3033_v6 = vpop.f32.mrf.mxu1 }
 0x54e   : > { %v2863_v6 = vld [vmem:[%s3912_s29 + $0x20] sm:$0xff] }
 0x5be   : > { %v1299_v7 = vpop.permute.xlu1 %1298 }
 0x5bf   : > { %v1301_v9 = vsel %vm959_vm2, %v1126_v3, %v1299_v7  ;;  %v2866_v3 = vld [vmem:[%s3912_s29 + $0x38] sm:$0xff] }
 0x5c0   : > { %3043 = vmatmul.mubr.msk.f32.vlgmr.msra.gmra.mxu0 %vm843_vm0, %v1301_v9 }
 0x5c1   : > { %3072 = vmatprep.mubr.msk.f32.mxu0 %vm3252_vm1, %v3251_v8  ;;  %3057 = vmatpush3.msra.mxu0 %v1516_v35 }
 0x5c2   : > { %3058 = vmatprep.subr.mxu0 %v3251_v8 }
 0x5c3   : > { %3059 = vmatpush3.msra.mxu0 %v1515_v36 }
 0x5c4   : > { %3060 = vmatprep.subr.mxu0 %v3251_v8 }
 0x5c5   : > { %3061 = vmatpush3.msra.mxu0 %v1514_v37 }
 0x5c6   : > { %3062 = vmatprep.subr.mxu0 %v3251_v8 }
 0x5c7   : > { %3063 = vmatpush3.msra.mxu0 %v1513_v38 }
 0x5c8   : > { %3064 = vmatprep.subr.mxu0 %v3251_v8 }
 0x5c9   : > { %3065 = vmatpush3.msra.mxu0 %v1512_v39 }
 0x5ca   : > { %3066 = vmatprep.subr.mxu0 %v3251_v8 }
 0x5cb   : > { %3067 = vmatpush3.msra.mxu0 %v1511_v40 }
 0x5cc   : > { %3068 = vmatprep.subr.mxu0 %v3251_v8 }
 0x5cd   : > { %3069 = vmatpush3.msra.mxu0 %v1510_v41 }
 0x5ce   : > { %3070 = vmatprep.subr.mxu0 %v3251_v8 }
 0x5cf   : > { %3071 = vmatpush3.msra.mxu0 %v1509_v42 }
 0x5d0   : > { %3096 = vmatprep.subr.mxu0 %v3251_v8 }
 0x680   : > { %v1382_v11 = vpop.f32.mrf.mxu0 }
 0x681   : > { %v1383_v12 = vadd.f32 %v2853_v10, %v1382_v11 }
 0x682   : > { %v3044_v13 = vpop.f32.mrf.mxu0 }
 0x683   : > { %v1386_v14 = vadd.f32 %v1383_v12, %v3445_v20  ;;  %v1417_v20 = vld [vmem:[%s3919_s11 + $0x8] sm:$0xff]  ;;  %v2861_v12 = vld [vmem:[%s3862_s14] ss:$0 sm:$0xff] }
 0x684   : > { %3050 = vmatpush3.msra.mxu1 %v1417_v20 }
 0x685   : > { %v1389_v15 = vsel %vm843_vm0, %v1386_v14, 0.0  ;;  %3051 = vmatprep.subr.mxu1 %v3251_v8 }
 0x686   : > { %1390 = vadd.xlane.f32.xlu1 %v1389_v15  ;;  %3052 = vmatpush3.msra.mxu1 %v1416_v24 }
 0x687   : > { %3075 = vmatprep.subr.mxu1 %v3251_v8 }
 0x70f   : > { %v1391_v16 = vpop.xlane.xlu1 %1390 }
 0x710   : > { %v1392_v17 = vmul.f32 0.03125, %v1391_v16 }
 0x712   : > { %v1393_v18 = vsub.f32 %v1386_v14, %v1392_v17  ;;  %v2862_v14 = vld [vmem:[%s3863_s15] ss:$0 sm:$0xff]  ;;  %v2868_v17 = vld [vmem:[%s3915_s2 + $0x1] ss:$0 sm:$0xff]  ;;  %s3932_s2 = sld [smem:[#allocation16_spill]] }
 0x714   : > { %v1394_v19 = vmul.f32 %v1393_v18, %v1393_v18 }
 0x716   : > { %v1395_v21 = vsel %vm843_vm0, %v1394_v19, 0.0 }
 0x717   : > { %1396 = vadd.xlane.f32.xlu0 %v1395_v21 }
 0x7a0   : > { %v1397_v25 = vpop.xlane.xlu0 %1396 }
 0x7a1   : > { %v1398_v26 = vmul.f32 0.03125, %v1397_v25 }
 0x7a3   : > { %v1399_v27 = vadd.f32 1e-12, %v1398_v26 }
 0x7a5   : > { %3217 = vrsqrt.f32 %v1399_v27 }
 0x7b2   : > { %v3218_v28 = vpop.eup %3217 }
 0x7b3   : > { %v1401_v30 = vmul.f32 %v3218_v28, %v1393_v18 }
 0x7b5   : > { %v1408_v32 = vmul.f32 %v2855_v29, %v1401_v30 }
 0x7b7   : > { %v1415_v33 = vadd.f32 %v2856_v31, %v1408_v32 }
 0x7b9   : > { %3054 = vmatmul.mubr.msk.f32.vlgmr.msra.gmra.mxu1 %vm843_vm0, %v1415_v33 }
 0x7ba   : > { %3083 = vmatprep.mubr.msk.f32.mxu1 %vm3252_vm1, %v3251_v8  ;;  %3076 = vmatpush3.msra.mxu1 %v2866_v3 }
 0x7bb   : > { %3077 = vmatprep.subr.mxu1 %v3251_v8 }
 0x7bc   : > { %3078 = vmatpush3.msra.mxu1 %v2865_v4 }
 0x7bd   : > { %3079 = vmatprep.subr.mxu1 %v3251_v8 }
 0x7be   : > { %3080 = vmatpush3.msra.mxu1 %v2864_v5 }
 0x7bf   : > { %3081 = vmatprep.subr.mxu1 %v3251_v8 }
 0x7c0   : > { %3082 = vmatpush3.msra.mxu1 %v2863_v6 }
 0x7c1   : > { %3086 = vmatprep.subr.mxu1 %v3251_v8 }
 0x879   : > { %v1496_v44 = vpop.f32.mrf.mxu1 }
 0x87a   : > { %v1497_v45 = vadd.f32 %v2857_v43, %v1496_v44 }
 0x87b   : > { %v3055_v46 = vpop.f32.mrf.mxu1 }
 0x87c   : > { %v1501_v47 = vmul.f32 0.044715, %v1497_v45  ;;  %v1500_v53 = vmul.f32 0.5, %v1497_v45 }
 0x87e   : > { %v1502_v48 = vmul.f32 %v1501_v47, %v1497_v45 }
 0x880   : > { %v1503_v49 = vmul.f32 %v1502_v48, %v1497_v45 }
 0x882   : > { %v1504_v50 = vadd.f32 %v1503_v49, %v1497_v45 }
 0x884   : > { %v1505_v51 = vmul.f32 0.7978846, %v1504_v50 }
 0x886   : > { %3219 = vtanh.f32 %v1505_v51 }
 0x893   : > { %v3220_v52 = vpop.eup %3219 }
 0x894   : > { %v1507_v54 = vadd.f32 1.0, %v3220_v52  ;;  %v2879_v52 = vld [vmem:[%s3917_s28 + $0x38] sm:$0xff] }
 0x896   : > { %v1508_v55 = vmul.f32 %v1507_v54, %v1500_v53  ;;  %v2878_v53 = vld [vmem:[%s3917_s28 + $0x30] sm:$0xff]  ;;  %v2877_v54 = vld [vmem:[%s3917_s28 + $0x28] sm:$0xff] }
 0x898   : > { %3073 = vmatmul.mubr.msk.f32.vlgmr.msra.gmra.mxu0 %vm1524_vm4, %v1508_v55  ;;  %v2876_v55 = vld [vmem:[%s3917_s28 + $0x20] sm:$0xff] }
 0x899   : > { %3098 = vmatprep.mubr.msk.f32.mxu0 %vm3252_vm1, %v3251_v8 }
 0x958   : > { %v1594_v57 = vpop.f32.mrf.mxu0 }
 0x959   : > { %v1595_v58 = vadd.f32 %v2859_v56, %v1594_v57 }
 0x95a   : > { %v3074_v59 = vpop.f32.mrf.mxu0 }
 0x95b   : > { %v1598_v60 = vadd.f32 %v1595_v58, %v1415_v33 }
 0x95d   : > { %v1601_v61 = vsel %vm843_vm0, %v1598_v60, 0.0 }
 0x95e   : > { %1602 = vadd.xlane.f32.xlu1 %v1601_v61 }
 0x9e7   : > { %v1603_v62 = vpop.xlane.xlu1 %1602 }
 0x9e8   : > { %v1604_v63 = vmul.f32 0.03125, %v1603_v62  ;;  %v2881_v62 = vld [vmem:[%s3918_s6 + $0x1] ss:$0 sm:$0xff] }
 0x9ea   : > { %v1605_v0 = vsub.f32 %v1598_v60, %v1604_v63 }
 0x9ec   : > { %v1606_v1 = vmul.f32 %v1605_v0, %v1605_v0 }
 0x9ee   : > { %v1607_v2 = vsel %vm843_vm0, %v1606_v1, 0.0 }
 0x9ef   : > { %1608 = vadd.xlane.f32.xlu1 %v1607_v2 }
 0xa78   : > { %v1609_v7 = vpop.xlane.xlu1 %1608 }
 0xa79   : > { %v1610_v9 = vmul.f32 0.03125, %v1609_v7 }
 0xa7b   : > { %v1611_v10 = vadd.f32 1e-12, %v1610_v9 }
 0xa7d   : > { %3221 = vrsqrt.f32 %v1611_v10  ;;  %v2890_v10 = vld [vmem:[%s3919_s11 + $0x38] sm:$0xff] }
 0xa8a   : > { %v3222_v11 = vpop.eup %3221 }
 0xa8b   : > { %v1613_v13 = vmul.f32 %v3222_v11, %v1605_v0  ;;  %v2889_v11 = vld [vmem:[%s3919_s11 + $0x30] sm:$0xff] }
 0xa8d   : > { %v1620_v15 = vmul.f32 %v2861_v12, %v1613_v13  ;;  %v2888_v12 = vld [vmem:[%s3919_s11 + $0x28] sm:$0xff]  ;;  %v2887_v13 = vld [vmem:[%s3919_s11 + $0x20] sm:$0xff] }
 0xa8f   : > { %v3606_v16 = vadd.f32 %v2862_v14, %v1620_v15 }
 0xa91   : > { %3084 = vmatmul.mubr.msk.f32.vlgmr.msra.gmra.mxu1 %vm843_vm0, %v3606_v16 }
 0xa92   : > { %3088 = vmatprep.mubr.msk.f32.mxu1 %vm3252_vm1, %v3251_v8 }
 0xb51   : > { %v1710_v18 = vpop.f32.mrf.mxu1 }
 0xb52   : > { %v1711_v19 = vadd.f32 %v2868_v17, %v1710_v18  ;;  %v2885_v18 = vld [vmem:[%s3920_s0 + $0x1] ss:$0 sm:$0xff] }
 0xb53   : > { %v3085_v21 = vpop.f32.mrf.mxu1 }
 0xb54   : > { %1882 = vrot.lane.b32.xlu1 %v1711_v19, %s3924_s3  ;;  %1715 = vrot.lane.b32.xlu0 %v1711_v19, %s3925_s5  ;;  %v2886_v21 = vld [vmem:[%s3921_s30 + $0x1] ss:$0 sm:$0xff]  ;;  %s3930_s5 = sld [smem:[#allocation15_spill]] }
 0xb58   : > { %1880 = vrot.lane.b32.xlu1 %v1711_v19, %s3926_s10  ;;  %s3931_s10 = sshll.u32 %s3935_s4, 3 }
 0xb59   : > { %s836_s6 = scalar_lea.vmem %s3932_s2, %s3931_s10 }
 0xbc6   : > { %v1883_v22 = vpop.permute.xlu1 %1882  ;;  %v1716_v23 = vpop.permute.xlu0 %1715 }
 0xbc7   : > { %3087 = vmatpush3.xpose.msk.msra.mxu1 %vm959_vm2, %v1716_v23  ;;  %3097 = vmatpush3.xpose.msk.msra.mxu0 %vm959_vm2, %v1883_v22 }
 0xbc8   : > { %3091 = vmatprep.subr.mxu1 %v3251_v8  ;;  %3106 = vmatprep.subr.mxu0 %v3251_v8 }
 0xbca   : > { %v1881_v20 = vpop.permute.xlu1 %1880  ;;  %3089 = vmatmul.mubr.msk.f32.vlgmr.msra.gmra.mxu1 %vm959_vm2, %v1711_v19 }
 0xbcb   : > { %3099 = vmatmul.mubr.msk.f32.vlgmr.msra.gmra.mxu0 %vm959_vm2, %v1881_v20  ;;  %3093 = vmatprep.mubr.msk.f32.mxu1 %vm3252_vm1, %v3251_v8  ;;  %v2901_v20 = vld [vmem:[%s3860_s12 + $0x78] sm:$0xff] }
 0xbcc   : > { %3114 = vmatprep.mubr.msk.f32.mxu0 %vm3252_vm1, %v3251_v8  ;;  %3107 = vmatpush3.msra.mxu0 %v2879_v52 }
 0xbcd   : > { %3108 = vmatprep.subr.mxu0 %v3251_v8 }
 0xbce   : > { %3109 = vmatpush3.msra.mxu0 %v2878_v53 }
 0xbcf   : > { %3110 = vmatprep.subr.mxu0 %v3251_v8 }
 0xbd0   : > { %3111 = vmatpush3.msra.mxu0 %v2877_v54 }
 0xbd1   : > { %3112 = vmatprep.subr.mxu0 %v3251_v8 }
 0xbd2   : > { %3113 = vmatpush3.msra.mxu0 %v2876_v55  ;;  %v2390_v55 = vld [vmem:[%s3864_s16 + $0x18] sm:$0xff] }
 0xbd3   : > { %3128 = vmatprep.subr.mxu0 %v3251_v8 }
 0xc8a   : > { %v1787_v24 = vpop.f32.mrf.mxu1 }
 0xc8b   : > { %v1791_v25 = vmul.f32 0.25, %v1787_v24  ;;  %v1954_v26 = vpop.f32.mrf.mxu0  ;;  %v2900_v24 = vld [vmem:[%s3860_s12 + $0x70] sm:$0xff] }
 0xc8c   : > { %v1958_v27 = vmul.f32 0.25, %v1954_v26  ;;  %v3090_v28 = vpop.f32.mrf.mxu1  ;;  %v2898_v26 = vld [vmem:[%s3860_s12 + $0x60] sm:$0xff] }
 0xc8d   : > { %v3100_v29 = vpop.f32.mrf.mxu0  ;;  %v1792_v30 = vadd.f32 %v1791_v25, %v3471_v34  ;;  %v2899_v25 = vld [vmem:[%s3860_s12 + $0x68] sm:$0xff]  ;;  %v2896_v28 = vld [vmem:[%s3860_s12 + $0x50] sm:$0xff] }
 0xc8e   : > { %v1959_v31 = vadd.f32 %v1958_v27, %v3471_v34  ;;  %v2897_v27 = vld [vmem:[%s3860_s12 + $0x58] sm:$0xff]  ;;  %v2895_v29 = vld [vmem:[%s3860_s12 + $0x48] sm:$0xff] }
 0xc8f   : > { %v1793_v32 = vsel %vm1042_vm3, %v1792_v30, -inf }
 0xc90   : > { %1794 = vmax.xlane.f32.xlu0 %v1793_v32  ;;  %v1960_v33 = vsel %vm1042_vm3, %v1959_v31, -inf }
 0xc91   : > { %1961 = vmax.xlane.f32.xlu1 %v1960_v33 }
 0xca2   : > { %1804 = vrot.lane.b32.xlu1 %v1711_v19, %s3927_s8  ;;  %s832_s8 = scalar_lea.vmem %s3874_s26, %s3935_s4 }
 0xd19   : > { %v1795_v35 = vpop.xlane.xlu0 %1794 }
 0xd1a   : > { %v1796_v36 = vsub.f32 %v1792_v30, %v1795_v35  ;;  %v1962_v37 = vpop.xlane.xlu1 %1961  ;;  %v2894_v30 = vld [vmem:[%s3860_s12 + $0x40] sm:$0xff] }
 0xd1b   : > { %v1963_v38 = vsub.f32 %v1959_v31, %v1962_v37  ;;  %v2892_v31 = vld [vmem:[%s3923_s1 + $0x1] ss:$0 sm:$0xff] }
 0xd1c   : > { %v1797_v39 = vmul.f32 1.442695, %v1796_v36 }
 0xd1d   : > { %v1964_v40 = vmul.f32 1.442695, %v1963_v38 }
 0xd1e   : > { %3223 = vpow2.f32 %v1797_v39  ;;  %v1805_v41 = vpop.permute.xlu1 %1804 }
 0xd1f   : > { %3092 = vmatpush3.msra.mxu1 %v1805_v41  ;;  %3225 = vpow2.f32 %v1964_v40 }
 0xd20   : > { %3101 = vmatprep.subr.mxu1 %v3251_v8 }
 0xd2b   : > { %v3224_v34 = vpop.eup %3223 }
 0xd2c   : > { %v1799_v42 = vsel %vm1042_vm3, %v3224_v34, 0.0  ;;  %v3226_v43 = vpop.eup %3225 }
 0xd2d   : > { %1800 = vadd.xlane.f32.xlu0 %v1799_v42  ;;  %v1966_v44 = vsel %vm1042_vm3, %v3226_v43, 0.0 }
 0xd31   : > { %1967 = vadd.xlane.f32.xlu0 %v1966_v44  ;;  %v2903_v44 = vld [vmem:[%s3861_s13 + $0x1] ss:$0 sm:$0xff] }
 0xd47   : > { %1971 = vrot.lane.b32.xlu0 %v1711_v19, %s3928_s9 }
 0xdb6   : > { %v1801_v45 = vpop.xlane.xlu0 %1800 }
 0xdb7   : > { %3227 = vrcp.f32 %v1801_v45 }
 0xdba   : > { %v1968_v46 = vpop.xlane.xlu0 %1967 }
 0xdbb   : > { %3229 = vrcp.f32 %v1968_v46 }
 0xdbe   : > { %v1972_v49 = vpop.permute.xlu0 %1971 }
 0xdc4   : > { %v3228_v47 = vpop.eup %3227 }
 0xdc5   : > { %v1803_v48 = vmul.f32 %v3228_v47, %v3224_v34 }
 0xdc7   : > { %3094 = vmatmul.mubr.msk.f32.vlgmr.msra.gmra.mxu1 %vm1042_vm3, %v1803_v48 }
 0xdc8   : > { %v3230_v50 = vpop.eup %3229  ;;  %3102 = vmatpush3.msra.mxu1 %v1972_v49  ;;  %3103 = vmatprep.mubr.msk.f32.mxu1 %vm3252_vm1, %v3251_v8 }
 0xdc9   : > { %v1970_v51 = vmul.f32 %v3230_v50, %v3226_v43  ;;  %3117 = vmatprep.subr.mxu1 %v3251_v8 }
 0xdcb   : > { %3104 = vmatmul.mubr.msk.f32.vlgmr.msra.gmra.mxu1 %vm1042_vm3, %v1970_v51 }
 0xdcc   : > { %3125 = vmatprep.mubr.msk.f32.mxu1 %vm3252_vm1, %v3251_v8  ;;  %3118 = vmatpush3.msra.mxu1 %v2890_v10  ;;  %v2468_v10 = vld [vmem:[%s3866_s18 + $0x10] sm:$0xff] }
 0xdcd   : > { %3119 = vmatprep.subr.mxu1 %v3251_v8 }
 0xdce   : > { %3120 = vmatpush3.msra.mxu1 %v2889_v11  ;;  %v2467_v11 = vld [vmem:[%s3866_s18 + $0x8] sm:$0xff] }
 0xdcf   : > { %3121 = vmatprep.subr.mxu1 %v3251_v8 }
 0xdd0   : > { %3122 = vmatpush3.msra.mxu1 %v2888_v12  ;;  %v2466_v12 = vld [vmem:[%s3866_s18] sm:$0xff] }
 0xdd1   : > { %3123 = vmatprep.subr.mxu1 %v3251_v8 }
 0xdd2   : > { %3124 = vmatpush3.msra.mxu1 %v2887_v13  ;;  %v2391_v13 = vld [vmem:[%s3865_s17] sm:$0x1] }
 0xdd3   : > { %3147 = vmatprep.subr.mxu1 %v3251_v8 }
 0xe87   : > { %v1876_v56 = vpop.f32.mrf.mxu1 }
 0xe89   : > { %v3095_v57 = vpop.f32.mrf.mxu1 }
 0xe8a   : > { %v2389_v57 = vld [vmem:[%s3864_s16 + $0x10] sm:$0xff] }
 0xe8b   : > { %v2043_v58 = vpop.f32.mrf.mxu1 }
 0xe8c   : > { %2048 = vrot.lane.b32.xlu1 %v2043_v58, %s3929_s27  ;;  %v2547_v58 = vld [vmem:[%s3868_s20 + $0x10] sm:$0xff] }
 0xe8d   : > { %v3105_v59 = vpop.f32.mrf.mxu1 }
 0xe8e   : > { %v2388_v59 = vld [vmem:[%s3864_s16 + $0x8] sm:$0xff] }
 0xefe   : > { %v2049_v60 = vpop.permute.xlu1 %2048 }
 0xeff   : > { %v2051_v61 = vsel %vm959_vm2, %v1876_v56, %v2049_v60  ;;  %v2548_v56 = vld [vmem:[%s3868_s20 + $0x18] sm:$0xff]  ;;  %v2546_v60 = vld [vmem:[%s3868_s20 + $0x8] sm:$0xff] }
 0xf00   : > { %3115 = vmatmul.mubr.msk.f32.vlgmr.msra.gmra.mxu0 %vm843_vm0, %v2051_v61  ;;  %v2387_v61 = vld [vmem:[%s3864_s16] sm:$0xff] }
 0xf01   : > { %3144 = vmatprep.mubr.msk.f32.mxu0 %vm3252_vm1, %v3251_v8  ;;  %3129 = vmatpush3.msra.mxu0 %v2901_v20 }
 0xf02   : > { %3130 = vmatprep.subr.mxu0 %v3251_v8 }
 0xf03   : > { %3131 = vmatpush3.msra.mxu0 %v2900_v24 }
 0xf04   : > { %3132 = vmatprep.subr.mxu0 %v3251_v8 }
 0xf05   : > { %3133 = vmatpush3.msra.mxu0 %v2899_v25 }
 0xf06   : > { %3134 = vmatprep.subr.mxu0 %v3251_v8 }
 0xf07   : > { %3135 = vmatpush3.msra.mxu0 %v2898_v26 }
 0xf08   : > { %3136 = vmatprep.subr.mxu0 %v3251_v8 }
 0xf09   : > { %3137 = vmatpush3.msra.mxu0 %v2897_v27 }
 0xf0a   : > { %3138 = vmatprep.subr.mxu0 %v3251_v8 }
 0xf0b   : > { %3139 = vmatpush3.msra.mxu0 %v2896_v28 }
 0xf0c   : > { %3140 = vmatprep.subr.mxu0 %v3251_v8 }
 0xf0d   : > { %3141 = vmatpush3.msra.mxu0 %v2895_v29 }
 0xf0e   : > { %3142 = vmatprep.subr.mxu0 %v3251_v8 }
 0xf0f   : > { %3143 = vmatpush3.msra.mxu0 %v2894_v30 }
 0xf10   : > { %3169 = vmatprep.subr.mxu0 %v3251_v8 }
 0xfc0   : > { %v2134_v63 = vpop.f32.mrf.mxu0 }
 0xfc1   : > { %v2135_v0 = vadd.f32 %v2881_v62, %v2134_v63  ;;  %v2545_v62 = vld [vmem:[%s3868_s20] sm:$0xff] }
 0xfc2   : > { %v3116_v1 = vpop.f32.mrf.mxu0 }
 0xfc3   : > { %v2138_v2 = vadd.f32 %v2135_v0, %v3606_v16 }
 0xfc5   : > { %v2143_v3 = vsel %vm843_vm0, %v2138_v2, 0.0 }
 0xfc6   : > { %2144 = vadd.xlane.f32.xlu1 %v2143_v3  ;;  %v2907_v3 = vld [vmem:[%s3862_s14 + $0x1] ss:$0 sm:$0xff] }
0x104f   : > { %v2145_v4 = vpop.xlane.xlu1 %2144 }
0x1050   : > { %v2146_v5 = vmul.f32 0.03125, %v2145_v4 }
0x1052   : > { %v2147_v6 = vsub.f32 %v2138_v2, %v2146_v5  ;;  %v2908_v5 = vld [vmem:[%s3863_s15 + $0x1] ss:$0 sm:$0xff] }
0x1054   : > { %v2148_v7 = vmul.f32 %v2147_v6, %v2147_v6 }
0x1056   : > { %v2149_v9 = vsel %vm843_vm0, %v2148_v7, 0.0 }
0x1057   : > { %2150 = vadd.xlane.f32.xlu0 %v2149_v9  ;;  %v2469_v9 = vld [vmem:[%s3866_s18 + $0x18] sm:$0xff] }
0x10e0   : > { %v2151_v14 = vpop.xlane.xlu0 %2150 }
0x10e1   : > { %v2152_v15 = vmul.f32 0.03125, %v2151_v14  ;;  %v2911_v14 = vld [vmem:[%s3869_s21] ss:$0 sm:$0xff] }
0x10e3   : > { %v2153_v16 = vadd.f32 1e-12, %v2152_v15 }
0x10e5   : > { %3231 = vrsqrt.f32 %v2153_v16 }
0x10f2   : > { %v3232_v17 = vpop.eup %3231 }
0x10f3   : > { %v2155_v19 = vmul.f32 %v3232_v17, %v2147_v6 }
0x10f5   : > { %v2162_v22 = vmul.f32 %v2885_v18, %v2155_v19 }
0x10f7   : > { %v2169_v23 = vadd.f32 %v2886_v21, %v2162_v22 }
0x10f9   : > { %3126 = vmatmul.mubr.msk.f32.vlgmr.msra.gmra.mxu1 %vm843_vm0, %v2169_v23 }
0x10fa   : > { %3155 = vmatprep.mubr.msk.f32.mxu1 %vm3252_vm1, %v3251_v8  ;;  %3148 = vmatpush3.msra.mxu1 %v2390_v55 }
0x10fb   : > { %3149 = vmatprep.subr.mxu1 %v3251_v8 }
0x10fc   : > { %3150 = vmatpush3.msra.mxu1 %v2389_v57 }
0x10fd   : > { %3151 = vmatprep.subr.mxu1 %v3251_v8 }
0x10fe   : > { %3152 = vmatpush3.msra.mxu1 %v2388_v59 }
0x10ff   : > { %3153 = vmatprep.subr.mxu1 %v3251_v8 }
0x1100   : > { %3154 = vmatpush3.msra.mxu1 %v2387_v61 }
0x1101   : > { %3158 = vmatprep.subr.mxu1 %v3251_v8 }
0x11b9   : > { %v2252_v32 = vpop.f32.mrf.mxu1 }
0x11ba   : > { %v2253_v33 = vadd.f32 %v2892_v31, %v2252_v32 }
0x11bb   : > { %v3127_v35 = vpop.f32.mrf.mxu1 }
0x11bc   : > { %v2257_v36 = vmul.f32 0.044715, %v2253_v33  ;;  %v2256_v34 = vmul.f32 0.5, %v2253_v33 }
0x11be   : > { %v2258_v37 = vmul.f32 %v2257_v36, %v2253_v33 }
0x11c0   : > { %v2259_v38 = vmul.f32 %v2258_v37, %v2253_v33 }
0x11c2   : > { %v2260_v39 = vadd.f32 %v2259_v38, %v2253_v33  ;;  %v2667_v38 = vld [vmem:[%s3872_s24 + $0x18] sm:$0xff] }
0x11c4   : > { %v2261_v40 = vmul.f32 0.7978846, %v2260_v39  ;;  %v2666_v39 = vld [vmem:[%s3872_s24 + $0x10] sm:$0xff] }
0x11c6   : > { %3233 = vtanh.f32 %v2261_v40  ;;  %v2665_v40 = vld [vmem:[%s3872_s24 + $0x8] sm:$0xff] }
0x11d3   : > { %v3234_v41 = vpop.eup %3233 }
0x11d4   : > { %v2263_v42 = vadd.f32 1.0, %v3234_v41  ;;  %v2470_v41 = vld [vmem:[%s3867_s19] sm:$0x1] }
0x11d6   : > { %v2264_v43 = vmul.f32 %v2263_v42, %v2256_v34  ;;  %v2664_v34 = vld [vmem:[%s3872_s24] sm:$0xff] }
0x11d8   : > { %3145 = vmatmul.mubr.msk.f32.vlgmr.msra.gmra.mxu0 %vm1524_vm4, %v2264_v43 }
0x11d9   : > { %3177 = vmatprep.mubr.msk.f32.mxu0 %vm3252_vm1, %v3251_v8  ;;  %3170 = vmatpush3.msra.mxu0 %v2548_v56 }
0x11da   : > { %3171 = vmatprep.subr.mxu0 %v3251_v8 }
0x11db   : > { %3172 = vmatpush3.msra.mxu0 %v2547_v58 }
0x11dc   : > { %3173 = vmatprep.subr.mxu0 %v3251_v8 }
0x11dd   : > { %3174 = vmatpush3.msra.mxu0 %v2546_v60 }
0x11de   : > { %3175 = vmatprep.subr.mxu0 %v3251_v8 }
0x11df   : > { %3176 = vmatpush3.msra.mxu0 %v2545_v62 }
0x1298   : > { %v2351_v45 = vpop.f32.mrf.mxu0 }
0x1299   : > { %v2352_v46 = vadd.f32 %v2903_v44, %v2351_v45 }
0x129a   : > { %v3146_v47 = vpop.f32.mrf.mxu0 }
0x129b   : > { %v2355_v48 = vadd.f32 %v2352_v46, %v2169_v23 }
0x129d   : > { %v2360_v49 = vsel %vm843_vm0, %v2355_v48, 0.0 }
0x129e   : > { %2361 = vadd.xlane.f32.xlu0 %v2360_v49  ;;  %v2913_v49 = vld [vmem:[%s3870_s22] ss:$0 sm:$0xff] }
0x1327   : > { %v2362_v50 = vpop.xlane.xlu0 %2361 }
0x1328   : > { %v2363_v51 = vmul.f32 0.03125, %v2362_v50 }
0x132a   : > { %v2364_v52 = vsub.f32 %v2355_v48, %v2363_v51  ;;  %v2914_v51 = vld [vmem:[%s3871_s23] ss:$0 sm:$0xff] }
0x132c   : > { %v2365_v53 = vmul.f32 %v2364_v52, %v2364_v52 }
0x132e   : > { %v2366_v54 = vsel %vm843_vm0, %v2365_v53, 0.0  ;;  %v2915_v53 = vld [vmem:[%s3930_s5] ss:$0 sm:$0xff] }
0x132f   : > { %2367 = vadd.xlane.f32.xlu1 %v2366_v54 }
0x13b8   : > { %v2368_v63 = vpop.xlane.xlu1 %2367 }
0x13b9   : > { %v2369_v0 = vmul.f32 0.03125, %v2368_v63 }
0x13bb   : > { %v2370_v1 = vadd.f32 1e-12, %v2369_v0 }
0x13bd   : > { %3235 = vrsqrt.f32 %v2370_v1 }
0x13ca   : > { %v3236_v2 = vpop.eup %3235 }
0x13cb   : > { %v2372_v4 = vmul.f32 %v3236_v2, %v2364_v52 }
0x13cd   : > { %v2379_v6 = vmul.f32 %v2907_v3, %v2372_v4 }
0x13cf   : > { %v2386_v7 = vadd.f32 %v2908_v5, %v2379_v6 }
0x13d1   : > { %3156 = vmatmul.mubr.msk.f32.vlgmr.msra.gmra.mxu1 %vm843_vm0, %v2386_v7  ;;  %3178 = vmatmul.mubr.msk.f32.vlgmr.msra.gmra.mxu0 %vm843_vm0, %v2386_v7 }
0x13d2   : > { %3166 = vmatprep.mubr.msk.f32.mxu1 %vm3252_vm1, %v3251_v8  ;;  %3159 = vmatpush3.msra.mxu1 %v2469_v9 }
0x13d3   : > { %3160 = vmatprep.subr.mxu1 %v3251_v8 }
0x13d4   : > { %3161 = vmatpush3.msra.mxu1 %v2468_v10 }
0x13d5   : > { %3162 = vmatprep.subr.mxu1 %v3251_v8 }
0x13d6   : > { %3163 = vmatpush3.msra.mxu1 %v2467_v11 }
0x13d7   : > { %3164 = vmatprep.subr.mxu1 %v3251_v8 }
0x13d8   : > { %3165 = vmatpush3.msra.mxu1 %v2466_v12 }
0x13d9   : > { %3180 = vmatprep.subr.mxu1 %v3251_v8 }
0x1491   : > { %v2461_v15 = vpop.f32.mrf.mxu1  ;;  %v2622_v16 = vpop.f32.mrf.mxu0 }
0x1492   : > { %v2462_v17 = vadd.f32 %v2461_v15, %v2391_v13  ;;  %v2623_v18 = vadd.f32 %v2911_v14, %v2622_v16 }
0x1493   : > { %v3157_v19 = vpop.f32.mrf.mxu1  ;;  %v3179_v21 = vpop.f32.mrf.mxu0 }
0x1494   : > { %3237 = vtanh.f32 %v2462_v17  ;;  %v2627_v22 = vmul.f32 0.044715, %v2623_v18  ;;  %v2626_v28 = vmul.f32 0.5, %v2623_v18 }
0x1496   : > { %v2628_v23 = vmul.f32 %v2627_v22, %v2623_v18 }
0x1498   : > { %v2629_v20 = vmul.f32 %v2628_v23, %v2623_v18 }
0x149a   : > { %v2630_v24 = vadd.f32 %v2629_v20, %v2623_v18 }
0x149c   : > { %v2631_v25 = vmul.f32 0.7978846, %v2630_v24 }
0x149e   : > { %3239 = vtanh.f32 %v2631_v25 }
0x14a1   : > { %v3238_v26 = vpop.eup %3237 }
0x14a2   : > { %3167 = vmatmul.mubr.msk.f32.vlgmr.msra.gmra.mxu1 %vm843_vm0, %v3238_v26 }
0x14a3   : > { %3188 = vmatprep.mubr.msk.f32.mxu1 %vm3252_vm1, %v3251_v8  ;;  %3181 = vmatpush3.msra.mxu1 %v2667_v38 }
0x14a4   : > { %3182 = vmatprep.subr.mxu1 %v3251_v8 }
0x14a5   : > { %3183 = vmatpush3.msra.mxu1 %v2666_v39 }
0x14a6   : > { %3184 = vmatprep.subr.mxu1 %v3251_v8 }
0x14a7   : > { %3185 = vmatpush3.msra.mxu1 %v2665_v40 }
0x14a8   : > { %3186 = vmatprep.subr.mxu1 %v3251_v8 }
0x14a9   : > { %3187 = vmatpush3.msra.mxu1 %v2664_v34 }
0x14ab   : > { %v3240_v27 = vpop.eup %3239 }
0x14ac   : > { %v2633_v29 = vadd.f32 1.0, %v3240_v27 }
0x14ae   : > { %v2634_v30 = vmul.f32 %v2633_v29, %v2626_v28 }
0x14b0   : > { %v2637_v31 = vsel %vm843_vm0, %v2634_v30, 0.0 }
0x14b1   : > { %2638 = vadd.xlane.f32.xlu0 %v2637_v31 }
0x153a   : > { %v2639_v32 = vpop.xlane.xlu0 %2638 }
0x153b   : > { %v2640_v33 = vmul.f32 0.03125, %v2639_v32 }
0x153d   : > { %v2641_v35 = vsub.f32 %v2634_v30, %v2640_v33 }
0x153f   : > { %v2642_v36 = vmul.f32 %v2641_v35, %v2641_v35 }
0x1541   : > { %v2643_v37 = vsel %vm843_vm0, %v2642_v36, 0.0 }
0x1542   : > { %2644 = vadd.xlane.f32.xlu1 %v2643_v37 }
0x1562   : > { %v2540_v42 = vpop.f32.mrf.mxu1 }
0x1563   : > { %v2541_v43 = vadd.f32 %v2540_v42, %v2470_v41 }
0x1564   : > { %v3168_v44 = vpop.f32.mrf.mxu1 }
0x1565   : > { %2544 = vst [vmem:[%s832_s8] sm:$0x1] %v2541_v43 }
0x15cb   : > { %v2645_v45 = vpop.xlane.xlu1 %2644 }
0x15cc   : > { %v2646_v46 = vmul.f32 0.03125, %v2645_v45 }
0x15ce   : > { %v2647_v47 = vadd.f32 1e-12, %v2646_v46 }
0x15d0   : > { %3241 = vrsqrt.f32 %v2647_v47 }
0x15dd   : > { %v3242_v48 = vpop.eup %3241 }
0x15de   : > { %v2649_v50 = vmul.f32 %v3242_v48, %v2641_v35 }
0x15e0   : > { %v2656_v52 = vmul.f32 %v2913_v49, %v2649_v50 }
0x15e2   : > { %v2663_v8 = vadd.f32 %v2914_v51, %v2656_v52 }
0x15e4   : > { %3189 = vmatmul.mubr.msk.f32.vlgmr.msra.gmra.mxu1 %vm843_vm0, %v2663_v8 }
0x16a4   : > { %v2744_v54 = vpop.f32.mrf.mxu1 }
0x16a5   : > { %v2745_v55 = vadd.f32 %v2915_v53, %v2744_v54 }
0x16a6   : > { %v3190_v56 = vpop.f32.mrf.mxu1 }
0x16a7   : > { %2748 = vst.msk [vmem:[%s836_s6] sm:$0xff] %vm1524_vm4, %v2745_v55 }
0x16a8 PF: > { %s3933_s9 = sld [smem:[#allocation2_spill]] }
0x16ae   : > { %s38_s7 = sadd.s32 1, %s3933_s9  }
0x16af   : > { %p35_p4 = scmp.ge.s32.totalorder %s38_s7, 6  }
0x16b1   :  { %37 = sbr.rel (!%p35_p4) target bundleno = 15 (0xf), region = 181 }

</bundles_post_ra>
